<compile_context>
chip_gen: v7x
topology: tpu7x:2x2x1
jax: 0.10.0
libtpu: 0.0.40
codegen_flags: <defaults>
</compile_context>

<pallas_src>
import math

import jax
import jax.numpy as jnp
from jax.experimental import pallas as pl
from jax.experimental.pallas import tpu as pltpu

# ------------------------- small config -------------------------
B = 2
SEQ_LEN = 8          # encoder sequence length
LABEL_LEN = 4
PRED_LEN = 4
DEC_LEN = LABEL_LEN + PRED_LEN
ENC_IN = 4
DEC_IN = 4
C_OUT = 4
D_MODEL = 32         # hidden size H (4H = 128 -> one lane width of gates)
E_LAYERS = 2
D_LAYERS = 1
MARK_DIM = 4         # embed='timeF', freq='h'

FEAT = 3 * ENC_IN + MARK_DIM      # im2col feature width (= 16, same for dec)
NE = SEQ_LEN * B                  # encoder rows (time-major, t*B + b)
ND = DEC_LEN * B                  # decoder rows
assert FEAT == 3 * DEC_IN + MARK_DIM
assert E_LAYERS == 2 and D_LAYERS == 1


# ------------------------- fused forward kernel -------------------------
def fused_forward_kernel(x_ref, enc_w_ref, dec_w_ref, out_ref):
    H = D_MODEL

    x_all = x_ref[...]            # (NE+ND, FEAT) im2col'd activations, time-major
    enc_w = enc_w_ref[...]        # (FEAT+NE+2H, 8H) packed encoder slab
    dec_w = dec_w_ref[...]        # (FEAT+ND+3H+1, 4H) packed decoder/proj slab

    # ---- static slices of the packed parameter slabs ----
    w_fold_enc = enc_w[0:FEAT, :]                      # (FEAT, 8H)  W_emb_enc @ W_ih1 (aug)
    pe_fold_enc = enc_w[FEAT:FEAT + NE, :]             # (NE, 8H)    pe @ W_ih1 + biases
    w_comb = enc_w[FEAT + NE:FEAT + NE + 2 * H, :]     # (2H, 8H)    [[whh1, wih2],[0, whh2]]

    r = 0
    w_fold_dec = dec_w[r:r + FEAT, :]; r += FEAT       # (FEAT, 4H)
    pe_fold_dec = dec_w[r:r + ND, :]; r += ND          # (ND, 4H)
    whh_dec = dec_w[r:r + H, :]; r += H                # (H, 4H)
    wpc = dec_w[r:r + H, 0:C_OUT]; r += H              # (H, C_OUT)
    wpd = dec_w[r:r + H, 0:C_OUT]; r += H              # (H, C_OUT)
    bp = dec_w[r:r + 1, 0:C_OUT]                       # (1, C_OUT)

    # ---------------- encoder: wavefronted 2-layer LSTM ----------------
    # gxb row (t*B+b) holds layer-1's input contribution at time t for batch b
    # (embedding folded in) plus both layers' biases, in the interleaved-gate
    # layout [i1 i2 f1 f2 g1 g2 o1 o2] with i/f/o pre-scaled by 0.5.
    x_enc = x_all[0:NE, :]
    gxb = jnp.dot(x_enc, w_fold_enc,
                  preferred_element_type=jnp.float32) + pe_fold_enc      # (NE, 8H)

    lane2h = jax.lax.broadcasted_iota(jnp.int32, (B, 2 * H), 1)
    keep_l1 = (lane2h < H).astype(jnp.float32)         # keeps layer-1 lanes, zeroes layer-2

    h_both = jnp.zeros((B, 2 * H), jnp.float32)        # [h1 | h2]
    c_both = jnp.zeros((B, 2 * H), jnp.float32)        # [c1 | c2]
    enc_hs = []                                        # layer-2 outputs h2_t, each (B, H)

    for s in range(SEQ_LEN + 1):                       # wavefront: l1 at step s, l2 at s-1
        t1 = min(s, SEQ_LEN - 1)                       # clamp for the layer-2-only epilogue
        g = (jnp.dot(h_both, w_comb, preferred_element_type=jnp.float32)
             + gxb[t1 * B:(t1 + 1) * B, :])            # (B, 8H)
        a = jnp.tanh(g)                                # single EUP pass over all gates
        sg = 0.5 * a + 0.5                             # sigmoid(x) = 0.5*tanh(0.5x)+0.5
        i_b = sg[:, 0 * 2 * H:1 * 2 * H]               # [i1 | i2]
        f_b = sg[:, 1 * 2 * H:2 * 2 * H]               # [f1 | f2]
        g_b = a[:, 2 * 2 * H:3 * 2 * H]                # [g1 | g2]  (unscaled tanh gate)
        o_b = sg[:, 3 * 2 * H:4 * 2 * H]               # [o1 | o2]
        c_both = f_b * c_both + i_b * g_b
        h_both = o_b * jnp.tanh(c_both)
        if s == 0:
            # layer-2's step at s=0 is spurious (its real step 0 runs at s=1):
            # reset its half of the state to the zero initial state.
            h_both = h_both * keep_l1
            c_both = c_both * keep_l1
        else:
            enc_hs.append(h_both[:, H:2 * H])          # h2_{s-1}

    enc_h_fin = h_both[:, H:2 * H]                     # encoder last-layer final h
    enc_c_fin = c_both[:, H:2 * H]                     # encoder last-layer final c

    # ---------------- decoder: 1-layer LSTM (init = encoder final state) ----------------
    x_dec = x_all[NE:NE + ND, :]
    gxd = jnp.dot(x_dec, w_fold_dec,
                  preferred_element_type=jnp.float32) + pe_fold_dec      # (ND, 4H)
    h = enc_h_fin
    c = enc_c_fin
    dec_hs = []
    for t in range(DEC_LEN):
        g = (jnp.dot(h, whh_dec, preferred_element_type=jnp.float32)
             + gxd[t * B:(t + 1) * B, :])              # (B, 4H)
        a = jnp.tanh(g)
        sg = 0.5 * a + 0.5
        i_g = sg[:, 0:H]
        f_g = sg[:, H:2 * H]
        g_g = a[:, 2 * H:3 * H]
        o_g = sg[:, 3 * H:4 * H]
        c = f_g * c + i_g * g_g
        h = o_g * jnp.tanh(c)
        dec_hs.append(h)

    # ---------------- attention + projection (off the serial chain) ----------------
    for b in range(B):
        enc_b = jnp.concatenate([hb[b:b + 1, :] for hb in enc_hs], axis=0)   # (SEQ_LEN, H)
        dec_b = jnp.concatenate([hb[b:b + 1, :] for hb in dec_hs], axis=0)   # (DEC_LEN, H)
        scores = jax.lax.dot_general(dec_b, enc_b, (((1,), (1,)), ((), ())),
                                     preferred_element_type=jnp.float32)     # (DEC_LEN, SEQ_LEN)
        m = jnp.max(scores, axis=-1, keepdims=True)
        e = jnp.exp(scores - m)
        attn = e / jnp.sum(e, axis=-1, keepdims=True)
        ctx = jnp.dot(attn, enc_b, preferred_element_type=jnp.float32)       # (DEC_LEN, H)
        out_b = (jnp.dot(ctx, wpc, preferred_element_type=jnp.float32)
                 + jnp.dot(dec_b, wpd, preferred_element_type=jnp.float32)
                 + bp)                                                        # (DEC_LEN, C_OUT)
        out_ref[b * DEC_LEN:(b + 1) * DEC_LEN, :] = out_b.astype(out_ref.dtype)


# ------------------------- parameter packing (done once, outside jit) -------------------------
def pack_kernel_args(params):
    """Fold embedding into LSTM input weights, pre-scale i/f/o gates by 0.5,
    build the wavefront block-diagonal encoder weight, and pack everything
    into two lane-dense f32 slabs."""
    H = D_MODEL

    # per-gate scale implementing sigmoid(x) = 0.5*tanh(0.5*x) + 0.5
    g4 = jnp.concatenate([jnp.full((H,), 0.5), jnp.full((H,), 0.5),
                          jnp.ones((H,)), jnp.full((H,), 0.5)]).astype(jnp.float32)

    def interleave_gates(w1, w2):
        # (..., 4H), (..., 4H) -> (..., 8H) laid out [i1 i2 f1 f2 g1 g2 o1 o2]
        blocks = []
        for k in range(4):
            blocks.append(w1[..., k * H:(k + 1) * H])
            blocks.append(w2[..., k * H:(k + 1) * H])
        return jnp.concatenate(blocks, axis=-1)

    def emb_matrix(emb):
        wconv, wtime, pe = emb
        w = jnp.concatenate([wconv[0], wconv[1], wconv[2], wtime], axis=0)  # (FEAT, D)
        pe_rep = jnp.repeat(pe, B, axis=0)                                  # (L*B, D) time-major
        return w, pe_rep

    w_emb_enc, pe_enc_rep = emb_matrix(params["emb_enc"])
    w_emb_dec, pe_dec_rep = emb_matrix(params["emb_dec"])

    (wih1, whh1, b1), (wih2, whh2, b2) = params["enc_lstm"]
    (wih3, whh3, b3) = params["dec_lstm"][0]

    g8 = interleave_gates(g4[None, :], g4[None, :])[0]                       # (8H,)

    # combined encoder recurrence weight:
    #   rows 0:H   (driven by h1): whh1 -> layer-1 gates, wih2 -> layer-2 gates
    #   rows H:2H  (driven by h2): zeros -> layer-1 gates, whh2 -> layer-2 gates
    w_comb = jnp.concatenate(
        [interleave_gates(whh1, wih2),
         interleave_gates(jnp.zeros_like(whh2), whh2)], axis=0) * g8[None, :]   # (2H, 8H)
    wih1_aug = interleave_gates(wih1, jnp.zeros_like(wih2)) * g8[None, :]       # (D, 8H)
    b_comb = interleave_gates(b1, b2) * g8[None, :]                             # (1, 8H)

    # fold the (im2col'd) embedding matmul into the LSTM input weights
    w_fold_enc = w_emb_enc @ wih1_aug                                           # (FEAT, 8H)
    pe_fold_enc = pe_enc_rep @ wih1_aug + b_comb                                # (NE, 8H)

    wih3_s = wih3 * g4[None, :]
    whh3_s = whh3 * g4[None, :]
    b3_s = b3 * g4[None, :]
    w_fold_dec = w_emb_dec @ wih3_s                                             # (FEAT, 4H)
    pe_fold_dec = pe_dec_rep @ wih3_s + b3_s                                    # (ND, 4H)

    # 256-lane slab: [w_fold_enc; pe_fold_enc; w_comb]
    enc_w = jnp.concatenate([w_fold_enc, pe_fold_enc, w_comb], axis=0)          # (FEAT+NE+2H, 8H)

    # 128-lane slab: [w_fold_dec; pe_fold_dec; whh3_s; wpc; wpd; bp] (proj cols zero-padded)
    def pad128(x):
        return jnp.pad(x, ((0, 0), (0, 4 * H - x.shape[1])))
    dec_w = jnp.concatenate([w_fold_dec, pe_fold_dec, whh3_s,
                             pad128(params["wpc"]), pad128(params["wpd"]),
                             pad128(params["bp"])], axis=0)                     # (FEAT+ND+3H+1, 4H)
    return enc_w.astype(jnp.float32), dec_w.astype(jnp.float32)


# ------------------------- jitted wrapper -------------------------
@jax.jit
def model_forward(x_enc, x_mark_enc, x_dec, x_mark_dec, enc_w, dec_w):
    # im2col for the circular Conv1d token embedding (kernel=3): one dense
    # (L*B, 16) activation matrix per side, time-major (row = t*B + b).
    def im2col(x, xm):
        feats = jnp.concatenate([jnp.roll(x, 1, axis=1), x, jnp.roll(x, -1, axis=1), xm],
                                axis=-1)                       # (B, L, FEAT)
        L = x.shape[1]
        return feats.transpose(1, 0, 2).reshape(L * B, FEAT)

    x_all = jnp.concatenate([im2col(x_enc, x_mark_enc),
                             im2col(x_dec, x_mark_dec)], axis=0).astype(jnp.float32)

    vmem = pl.BlockSpec(memory_space=pltpu.MemorySpace.VMEM)
    out2 = pl.pallas_call(
        fused_forward_kernel,
        out_shape=jax.ShapeDtypeStruct((B * DEC_LEN, C_OUT), jnp.float32),
        in_specs=[vmem, vmem, vmem],
        out_specs=vmem,
    )(x_all, enc_w, dec_w)

    out = out2.reshape(B, DEC_LEN, C_OUT)
    return out[:, -PRED_LEN:, :]


# ------------------------- pure-JAX reference -------------------------
def ref_forward(x_enc, x_mark_enc, x_dec, x_mark_dec, params):
    H = D_MODEL

    def embed(x, xm, emb):
        wconv, wtime, pe = emb
        xp = jnp.roll(x, 1, axis=1)
        xn = jnp.roll(x, -1, axis=1)
        return xp @ wconv[0] + x @ wconv[1] + xn @ wconv[2] + xm @ wtime + pe[None]

    def lstm(x, h0, c0, layers):
        out = x
        hl, cl = h0, c0
        for (wih, whh, b) in layers:
            def step(carry, xt):
                h, c = carry
                g = xt @ wih + h @ whh + b
                i = jax.nn.sigmoid(g[:, :H])
                f = jax.nn.sigmoid(g[:, H:2 * H])
                gg = jnp.tanh(g[:, 2 * H:3 * H])
                o = jax.nn.sigmoid(g[:, 3 * H:])
                c = f * c + i * gg
                h = o * jnp.tanh(c)
                return (h, c), h
            (hl, cl), ys = jax.lax.scan(step, (h0, c0), jnp.transpose(out, (1, 0, 2)))
            out = jnp.transpose(ys, (1, 0, 2))
        return out, hl, cl

    enc_emb = embed(x_enc, x_mark_enc, params["emb_enc"])
    dec_emb = embed(x_dec, x_mark_dec, params["emb_dec"])
    zeros = jnp.zeros((x_enc.shape[0], H), jnp.float32)
    enc_y, enc_h, enc_c = lstm(enc_emb, zeros, zeros, params["enc_lstm"])
    dec_y, _, _ = lstm(dec_emb, enc_h, enc_c, params["dec_lstm"])
    scores = jnp.einsum("bld,bkd->blk", dec_y, enc_y)
    attn = jax.nn.softmax(scores, axis=-1)
    ctx = jnp.einsum("blk,bkd->bld", attn, enc_y)
    out = ctx @ params["wpc"] + dec_y @ params["wpd"] + params["bp"]
    return out[:, -PRED_LEN:, :]


# ------------------------- params / inputs -------------------------
def init_params(key):
    ks = iter(jax.random.split(key, 32))

    def unif(k, shape, fan_in):
        bound = 1.0 / math.sqrt(fan_in)
        return jax.random.uniform(k, shape, jnp.float32, -bound, bound)

    def embed_params(c_in, L):
        wconv = unif(next(ks), (3, c_in, D_MODEL), 3 * c_in)   # per-tap (c_in, d_model)
        wtime = unif(next(ks), (MARK_DIM, D_MODEL), MARK_DIM)  # timeF linear, no bias
        pos = jnp.arange(L, dtype=jnp.float32)[:, None]
        div = jnp.exp(jnp.arange(0, D_MODEL, 2, dtype=jnp.float32)
                      * (-math.log(10000.0) / D_MODEL))
        pe = jnp.zeros((L, D_MODEL), jnp.float32)
        pe = pe.at[:, 0::2].set(jnp.sin(pos * div))
        pe = pe.at[:, 1::2].set(jnp.cos(pos * div))
        return (wconv, wtime, pe)

    def lstm_params(num_layers):
        layers = []
        for _ in range(num_layers):
            wih = unif(next(ks), (D_MODEL, 4 * D_MODEL), D_MODEL)  # W_ih^T
            whh = unif(next(ks), (D_MODEL, 4 * D_MODEL), D_MODEL)  # W_hh^T
            b = unif(next(ks), (1, 4 * D_MODEL), D_MODEL)          # b_ih + b_hh combined
            layers.append((wih, whh, b))
        return layers

    return dict(
        emb_enc=embed_params(ENC_IN, SEQ_LEN),
        emb_dec=embed_params(DEC_IN, DEC_LEN),
        enc_lstm=lstm_params(E_LAYERS),
        dec_lstm=lstm_params(D_LAYERS),
        wpc=unif(next(ks), (D_MODEL, C_OUT), 2 * D_MODEL),   # projection W^T[:H]
        wpd=unif(next(ks), (D_MODEL, C_OUT), 2 * D_MODEL),   # projection W^T[H:]
        bp=unif(next(ks), (1, C_OUT), 2 * D_MODEL),
    )


if __name__ == "__main__":
    root = jax.random.PRNGKey(0)
    kp, k0, k1, k2, k3 = jax.random.split(root, 5)
    params = init_params(kp)

    x_enc = jax.random.normal(k0, (B, SEQ_LEN, ENC_IN), jnp.float32)
    x_mark_enc = jax.random.normal(k1, (B, SEQ_LEN, MARK_DIM), jnp.float32)
    x_dec = jax.random.normal(k2, (B, DEC_LEN, DEC_IN), jnp.float32)
    x_mark_dec = jax.random.normal(k3, (B, DEC_LEN, MARK_DIM), jnp.float32)

    enc_w, dec_w = pack_kernel_args(params)
    out = model_forward(x_enc, x_mark_enc, x_dec, x_mark_dec, enc_w, dec_w)
    out = jax.block_until_ready(out)
    assert out.shape == (B, PRED_LEN, C_OUT), out.shape

    ref = jax.block_until_ready(
        ref_forward(x_enc, x_mark_enc, x_dec, x_mark_dec, params))
    err = float(jnp.max(jnp.abs(out - ref)))
    assert err < 2e-3, f"kernel/reference mismatch: max abs err {err}"

    print("KERNEL_OK")
</pallas_src>

<mosaic_0001>
module attributes {stable_mosaic.version = 11 : i64} {
  func.func @fused_forward_kernel(%arg0: memref<32x16xf32, #tpu.memory_space<vmem>>, %arg1: memref<96x256xf32, #tpu.memory_space<vmem>>, %arg2: memref<129x128xf32, #tpu.memory_space<vmem>>, %arg3: memref<16x4xf32, #tpu.memory_space<vmem>>) attributes {dimension_semantics = [], scalar_prefetch = 0 : i64, scratch_operands = 0 : i64, tpu.core_type = #tpu.core_type<tc>} {
    %c0 = arith.constant 0 : index
    %c0_0 = arith.constant 0 : index
    %0 = vector.load %arg0[%c0, %c0_0] : memref<32x16xf32, #tpu.memory_space<vmem>>, vector<32x16xf32>
    %c0_1 = arith.constant 0 : index
    %c0_2 = arith.constant 0 : index
    %1 = vector.load %arg1[%c0_1, %c0_2] : memref<96x256xf32, #tpu.memory_space<vmem>>, vector<96x256xf32>
    %c0_3 = arith.constant 0 : index
    %c0_4 = arith.constant 0 : index
    %2 = vector.load %arg2[%c0_3, %c0_4] : memref<129x128xf32, #tpu.memory_space<vmem>>, vector<129x128xf32>
    %3 = vector.extract_strided_slice %1 {offsets = [0, 0], sizes = [16, 256], strides = [1, 1]} : vector<96x256xf32> to vector<16x256xf32>
    %4 = vector.extract_strided_slice %1 {offsets = [16, 0], sizes = [16, 256], strides = [1, 1]} : vector<96x256xf32> to vector<16x256xf32>
    %5 = vector.extract_strided_slice %1 {offsets = [32, 0], sizes = [64, 256], strides = [1, 1]} : vector<96x256xf32> to vector<64x256xf32>
    %6 = vector.extract_strided_slice %2 {offsets = [0, 0], sizes = [16, 128], strides = [1, 1]} : vector<129x128xf32> to vector<16x128xf32>
    %7 = vector.extract_strided_slice %2 {offsets = [16, 0], sizes = [16, 128], strides = [1, 1]} : vector<129x128xf32> to vector<16x128xf32>
    %8 = vector.extract_strided_slice %2 {offsets = [32, 0], sizes = [32, 128], strides = [1, 1]} : vector<129x128xf32> to vector<32x128xf32>
    %9 = vector.extract_strided_slice %2 {offsets = [64, 0], sizes = [32, 4], strides = [1, 1]} : vector<129x128xf32> to vector<32x4xf32>
    %10 = vector.extract_strided_slice %2 {offsets = [96, 0], sizes = [32, 4], strides = [1, 1]} : vector<129x128xf32> to vector<32x4xf32>
    %11 = vector.extract_strided_slice %2 {offsets = [128, 0], sizes = [1, 4], strides = [1, 1]} : vector<129x128xf32> to vector<1x4xf32>
    %12 = vector.extract_strided_slice %0 {offsets = [0, 0], sizes = [16, 16], strides = [1, 1]} : vector<32x16xf32> to vector<16x16xf32>
    %cst = arith.constant dense<0.000000e+00> : vector<16x256xf32>
    %13 = tpu.matmul %12, %3, %cst {dimension_numbers = #tpu.dot_dimension_numbers<[1], [0], [0], [1], [0, 0, 1, 1], [], []>} : vector<16x16xf32>, vector<16x256xf32>, vector<16x256xf32> -> vector<16x256xf32>
    %14 = arith.addf %13, %4 : vector<16x256xf32>
    %15 = tpu.iota {dimensions = array<i32: 1>} : vector<2x64xi32>
    %c32_i32 = arith.constant 32 : i32
    %16 = vector.broadcast %c32_i32 : i32 to vector<2x64xi32>
    %17 = arith.cmpi slt, %15, %16 : vector<2x64xi32>
    %18 = arith.extui %17 : vector<2x64xi1> to vector<2x64xi32>
    %19 = arith.sitofp %18 : vector<2x64xi32> to vector<2x64xf32>
    %cst_5 = arith.constant 0.000000e+00 : f32
    %20 = vector.broadcast %cst_5 : f32 to vector<2x64xf32>
    %cst_6 = arith.constant 0.000000e+00 : f32
    %21 = vector.broadcast %cst_6 : f32 to vector<2x64xf32>
    %cst_7 = arith.constant dense<0.000000e+00> : vector<2x256xf32>
    %22 = tpu.matmul %20, %5, %cst_7 {dimension_numbers = #tpu.dot_dimension_numbers<[1], [0], [0], [1], [0, 0, 1, 1], [], []>} : vector<2x64xf32>, vector<64x256xf32>, vector<2x256xf32> -> vector<2x256xf32>
    %23 = vector.extract_strided_slice %14 {offsets = [0, 0], sizes = [2, 256], strides = [1, 1]} : vector<16x256xf32> to vector<2x256xf32>
    %24 = arith.addf %22, %23 : vector<2x256xf32>
    %25 = math.tanh %24 : vector<2x256xf32>
    %cst_8 = arith.constant 5.000000e-01 : f32
    %26 = vector.broadcast %cst_8 : f32 to vector<2x256xf32>
    %27 = arith.mulf %26, %25 : vector<2x256xf32>
    %cst_9 = arith.constant 5.000000e-01 : f32
    %28 = vector.broadcast %cst_9 : f32 to vector<2x256xf32>
    %29 = arith.addf %27, %28 : vector<2x256xf32>
    %30 = vector.extract_strided_slice %29 {offsets = [0, 0], sizes = [2, 64], strides = [1, 1]} : vector<2x256xf32> to vector<2x64xf32>
    %31 = vector.extract_strided_slice %29 {offsets = [0, 64], sizes = [2, 64], strides = [1, 1]} : vector<2x256xf32> to vector<2x64xf32>
    %32 = vector.extract_strided_slice %25 {offsets = [0, 128], sizes = [2, 64], strides = [1, 1]} : vector<2x256xf32> to vector<2x64xf32>
    %33 = vector.extract_strided_slice %29 {offsets = [0, 192], sizes = [2, 64], strides = [1, 1]} : vector<2x256xf32> to vector<2x64xf32>
    %34 = arith.mulf %31, %21 : vector<2x64xf32>
    %35 = arith.mulf %30, %32 : vector<2x64xf32>
    %36 = arith.addf %34, %35 : vector<2x64xf32>
    %37 = math.tanh %36 : vector<2x64xf32>
    %38 = arith.mulf %33, %37 : vector<2x64xf32>
    %39 = arith.mulf %38, %19 : vector<2x64xf32>
    %40 = arith.mulf %36, %19 : vector<2x64xf32>
    %cst_10 = arith.constant dense<0.000000e+00> : vector<2x256xf32>
    %41 = tpu.matmul %39, %5, %cst_10 {dimension_numbers = #tpu.dot_dimension_numbers<[1], [0], [0], [1], [0, 0, 1, 1], [], []>} : vector<2x64xf32>, vector<64x256xf32>, vector<2x256xf32> -> vector<2x256xf32>
    %42 = vector.extract_strided_slice %14 {offsets = [2, 0], sizes = [2, 256], strides = [1, 1]} : vector<16x256xf32> to vector<2x256xf32>
    %43 = arith.addf %41, %42 : vector<2x256xf32>
    %44 = math.tanh %43 : vector<2x256xf32>
    %cst_11 = arith.constant 5.000000e-01 : f32
    %45 = vector.broadcast %cst_11 : f32 to vector<2x256xf32>
    %46 = arith.mulf %45, %44 : vector<2x256xf32>
    %cst_12 = arith.constant 5.000000e-01 : f32
    %47 = vector.broadcast %cst_12 : f32 to vector<2x256xf32>
    %48 = arith.addf %46, %47 : vector<2x256xf32>
    %49 = vector.extract_strided_slice %48 {offsets = [0, 0], sizes = [2, 64], strides = [1, 1]} : vector<2x256xf32> to vector<2x64xf32>
    %50 = vector.extract_strided_slice %48 {offsets = [0, 64], sizes = [2, 64], strides = [1, 1]} : vector<2x256xf32> to vector<2x64xf32>
    %51 = vector.extract_strided_slice %44 {offsets = [0, 128], sizes = [2, 64], strides = [1, 1]} : vector<2x256xf32> to vector<2x64xf32>
    %52 = vector.extract_strided_slice %48 {offsets = [0, 192], sizes = [2, 64], strides = [1, 1]} : vector<2x256xf32> to vector<2x64xf32>
    %53 = arith.mulf %50, %40 : vector<2x64xf32>
    %54 = arith.mulf %49, %51 : vector<2x64xf32>
    %55 = arith.addf %53, %54 : vector<2x64xf32>
    %56 = math.tanh %55 : vector<2x64xf32>
    %57 = arith.mulf %52, %56 : vector<2x64xf32>
    %58 = vector.extract_strided_slice %57 {offsets = [0, 32], sizes = [2, 32], strides = [1, 1]} : vector<2x64xf32> to vector<2x32xf32>
    %cst_13 = arith.constant dense<0.000000e+00> : vector<2x256xf32>
    %59 = tpu.matmul %57, %5, %cst_13 {dimension_numbers = #tpu.dot_dimension_numbers<[1], [0], [0], [1], [0, 0, 1, 1], [], []>} : vector<2x64xf32>, vector<64x256xf32>, vector<2x256xf32> -> vector<2x256xf32>
    %60 = vector.extract_strided_slice %14 {offsets = [4, 0], sizes = [2, 256], strides = [1, 1]} : vector<16x256xf32> to vector<2x256xf32>
    %61 = arith.addf %59, %60 : vector<2x256xf32>
    %62 = math.tanh %61 : vector<2x256xf32>
    %cst_14 = arith.constant 5.000000e-01 : f32
    %63 = vector.broadcast %cst_14 : f32 to vector<2x256xf32>
    %64 = arith.mulf %63, %62 : vector<2x256xf32>
    %cst_15 = arith.constant 5.000000e-01 : f32
    %65 = vector.broadcast %cst_15 : f32 to vector<2x256xf32>
    %66 = arith.addf %64, %65 : vector<2x256xf32>
    %67 = vector.extract_strided_slice %66 {offsets = [0, 0], sizes = [2, 64], strides = [1, 1]} : vector<2x256xf32> to vector<2x64xf32>
    %68 = vector.extract_strided_slice %66 {offsets = [0, 64], sizes = [2, 64], strides = [1, 1]} : vector<2x256xf32> to vector<2x64xf32>
    %69 = vector.extract_strided_slice %62 {offsets = [0, 128], sizes = [2, 64], strides = [1, 1]} : vector<2x256xf32> to vector<2x64xf32>
    %70 = vector.extract_strided_slice %66 {offsets = [0, 192], sizes = [2, 64], strides = [1, 1]} : vector<2x256xf32> to vector<2x64xf32>
    %71 = arith.mulf %68, %55 : vector<2x64xf32>
    %72 = arith.mulf %67, %69 : vector<2x64xf32>
    %73 = arith.addf %71, %72 : vector<2x64xf32>
    %74 = math.tanh %73 : vector<2x64xf32>
    %75 = arith.mulf %70, %74 : vector<2x64xf32>
    %76 = vector.extract_strided_slice %75 {offsets = [0, 32], sizes = [2, 32], strides = [1, 1]} : vector<2x64xf32> to vector<2x32xf32>
    %cst_16 = arith.constant dense<0.000000e+00> : vector<2x256xf32>
    %77 = tpu.matmul %75, %5, %cst_16 {dimension_numbers = #tpu.dot_dimension_numbers<[1], [0], [0], [1], [0, 0, 1, 1], [], []>} : vector<2x64xf32>, vector<64x256xf32>, vector<2x256xf32> -> vector<2x256xf32>
    %78 = vector.extract_strided_slice %14 {offsets = [6, 0], sizes = [2, 256], strides = [1, 1]} : vector<16x256xf32> to vector<2x256xf32>
    %79 = arith.addf %77, %78 : vector<2x256xf32>
    %80 = math.tanh %79 : vector<2x256xf32>
    %cst_17 = arith.constant 5.000000e-01 : f32
    %81 = vector.broadcast %cst_17 : f32 to vector<2x256xf32>
    %82 = arith.mulf %81, %80 : vector<2x256xf32>
    %cst_18 = arith.constant 5.000000e-01 : f32
    %83 = vector.broadcast %cst_18 : f32 to vector<2x256xf32>
    %84 = arith.addf %82, %83 : vector<2x256xf32>
    %85 = vector.extract_strided_slice %84 {offsets = [0, 0], sizes = [2, 64], strides = [1, 1]} : vector<2x256xf32> to vector<2x64xf32>
    %86 = vector.extract_strided_slice %84 {offsets = [0, 64], sizes = [2, 64], strides = [1, 1]} : vector<2x256xf32> to vector<2x64xf32>
    %87 = vector.extract_strided_slice %80 {offsets = [0, 128], sizes = [2, 64], strides = [1, 1]} : vector<2x256xf32> to vector<2x64xf32>
    %88 = vector.extract_strided_slice %84 {offsets = [0, 192], sizes = [2, 64], strides = [1, 1]} : vector<2x256xf32> to vector<2x64xf32>
    %89 = arith.mulf %86, %73 : vector<2x64xf32>
    %90 = arith.mulf %85, %87 : vector<2x64xf32>
    %91 = arith.addf %89, %90 : vector<2x64xf32>
    %92 = math.tanh %91 : vector<2x64xf32>
    %93 = arith.mulf %88, %92 : vector<2x64xf32>
    %94 = vector.extract_strided_slice %93 {offsets = [0, 32], sizes = [2, 32], strides = [1, 1]} : vector<2x64xf32> to vector<2x32xf32>
    %cst_19 = arith.constant dense<0.000000e+00> : vector<2x256xf32>
    %95 = tpu.matmul %93, %5, %cst_19 {dimension_numbers = #tpu.dot_dimension_numbers<[1], [0], [0], [1], [0, 0, 1, 1], [], []>} : vector<2x64xf32>, vector<64x256xf32>, vector<2x256xf32> -> vector<2x256xf32>
    %96 = vector.extract_strided_slice %14 {offsets = [8, 0], sizes = [2, 256], strides = [1, 1]} : vector<16x256xf32> to vector<2x256xf32>
    %97 = arith.addf %95, %96 : vector<2x256xf32>
    %98 = math.tanh %97 : vector<2x256xf32>
    %cst_20 = arith.constant 5.000000e-01 : f32
    %99 = vector.broadcast %cst_20 : f32 to vector<2x256xf32>
    %100 = arith.mulf %99, %98 : vector<2x256xf32>
    %cst_21 = arith.constant 5.000000e-01 : f32
    %101 = vector.broadcast %cst_21 : f32 to vector<2x256xf32>
    %102 = arith.addf %100, %101 : vector<2x256xf32>
    %103 = vector.extract_strided_slice %102 {offsets = [0, 0], sizes = [2, 64], strides = [1, 1]} : vector<2x256xf32> to vector<2x64xf32>
    %104 = vector.extract_strided_slice %102 {offsets = [0, 64], sizes = [2, 64], strides = [1, 1]} : vector<2x256xf32> to vector<2x64xf32>
    %105 = vector.extract_strided_slice %98 {offsets = [0, 128], sizes = [2, 64], strides = [1, 1]} : vector<2x256xf32> to vector<2x64xf32>
    %106 = vector.extract_strided_slice %102 {offsets = [0, 192], sizes = [2, 64], strides = [1, 1]} : vector<2x256xf32> to vector<2x64xf32>
    %107 = arith.mulf %104, %91 : vector<2x64xf32>
    %108 = arith.mulf %103, %105 : vector<2x64xf32>
    %109 = arith.addf %107, %108 : vector<2x64xf32>
    %110 = math.tanh %109 : vector<2x64xf32>
    %111 = arith.mulf %106, %110 : vector<2x64xf32>
    %112 = vector.extract_strided_slice %111 {offsets = [0, 32], sizes = [2, 32], strides = [1, 1]} : vector<2x64xf32> to vector<2x32xf32>
    %cst_22 = arith.constant dense<0.000000e+00> : vector<2x256xf32>
    %113 = tpu.matmul %111, %5, %cst_22 {dimension_numbers = #tpu.dot_dimension_numbers<[1], [0], [0], [1], [0, 0, 1, 1], [], []>} : vector<2x64xf32>, vector<64x256xf32>, vector<2x256xf32> -> vector<2x256xf32>
    %114 = vector.extract_strided_slice %14 {offsets = [10, 0], sizes = [2, 256], strides = [1, 1]} : vector<16x256xf32> to vector<2x256xf32>
    %115 = arith.addf %113, %114 : vector<2x256xf32>
    %116 = math.tanh %115 : vector<2x256xf32>
    %cst_23 = arith.constant 5.000000e-01 : f32
    %117 = vector.broadcast %cst_23 : f32 to vector<2x256xf32>
    %118 = arith.mulf %117, %116 : vector<2x256xf32>
    %cst_24 = arith.constant 5.000000e-01 : f32
    %119 = vector.broadcast %cst_24 : f32 to vector<2x256xf32>
    %120 = arith.addf %118, %119 : vector<2x256xf32>
    %121 = vector.extract_strided_slice %120 {offsets = [0, 0], sizes = [2, 64], strides = [1, 1]} : vector<2x256xf32> to vector<2x64xf32>
    %122 = vector.extract_strided_slice %120 {offsets = [0, 64], sizes = [2, 64], strides = [1, 1]} : vector<2x256xf32> to vector<2x64xf32>
    %123 = vector.extract_strided_slice %116 {offsets = [0, 128], sizes = [2, 64], strides = [1, 1]} : vector<2x256xf32> to vector<2x64xf32>
    %124 = vector.extract_strided_slice %120 {offsets = [0, 192], sizes = [2, 64], strides = [1, 1]} : vector<2x256xf32> to vector<2x64xf32>
    %125 = arith.mulf %122, %109 : vector<2x64xf32>
    %126 = arith.mulf %121, %123 : vector<2x64xf32>
    %127 = arith.addf %125, %126 : vector<2x64xf32>
    %128 = math.tanh %127 : vector<2x64xf32>
    %129 = arith.mulf %124, %128 : vector<2x64xf32>
    %130 = vector.extract_strided_slice %129 {offsets = [0, 32], sizes = [2, 32], strides = [1, 1]} : vector<2x64xf32> to vector<2x32xf32>
    %cst_25 = arith.constant dense<0.000000e+00> : vector<2x256xf32>
    %131 = tpu.matmul %129, %5, %cst_25 {dimension_numbers = #tpu.dot_dimension_numbers<[1], [0], [0], [1], [0, 0, 1, 1], [], []>} : vector<2x64xf32>, vector<64x256xf32>, vector<2x256xf32> -> vector<2x256xf32>
    %132 = vector.extract_strided_slice %14 {offsets = [12, 0], sizes = [2, 256], strides = [1, 1]} : vector<16x256xf32> to vector<2x256xf32>
    %133 = arith.addf %131, %132 : vector<2x256xf32>
    %134 = math.tanh %133 : vector<2x256xf32>
    %cst_26 = arith.constant 5.000000e-01 : f32
    %135 = vector.broadcast %cst_26 : f32 to vector<2x256xf32>
    %136 = arith.mulf %135, %134 : vector<2x256xf32>
    %cst_27 = arith.constant 5.000000e-01 : f32
    %137 = vector.broadcast %cst_27 : f32 to vector<2x256xf32>
    %138 = arith.addf %136, %137 : vector<2x256xf32>
    %139 = vector.extract_strided_slice %138 {offsets = [0, 0], sizes = [2, 64], strides = [1, 1]} : vector<2x256xf32> to vector<2x64xf32>
    %140 = vector.extract_strided_slice %138 {offsets = [0, 64], sizes = [2, 64], strides = [1, 1]} : vector<2x256xf32> to vector<2x64xf32>
    %141 = vector.extract_strided_slice %134 {offsets = [0, 128], sizes = [2, 64], strides = [1, 1]} : vector<2x256xf32> to vector<2x64xf32>
    %142 = vector.extract_strided_slice %138 {offsets = [0, 192], sizes = [2, 64], strides = [1, 1]} : vector<2x256xf32> to vector<2x64xf32>
    %143 = arith.mulf %140, %127 : vector<2x64xf32>
    %144 = arith.mulf %139, %141 : vector<2x64xf32>
    %145 = arith.addf %143, %144 : vector<2x64xf32>
    %146 = math.tanh %145 : vector<2x64xf32>
    %147 = arith.mulf %142, %146 : vector<2x64xf32>
    %148 = vector.extract_strided_slice %147 {offsets = [0, 32], sizes = [2, 32], strides = [1, 1]} : vector<2x64xf32> to vector<2x32xf32>
    %cst_28 = arith.constant dense<0.000000e+00> : vector<2x256xf32>
    %149 = tpu.matmul %147, %5, %cst_28 {dimension_numbers = #tpu.dot_dimension_numbers<[1], [0], [0], [1], [0, 0, 1, 1], [], []>} : vector<2x64xf32>, vector<64x256xf32>, vector<2x256xf32> -> vector<2x256xf32>
    %150 = vector.extract_strided_slice %14 {offsets = [14, 0], sizes = [2, 256], strides = [1, 1]} : vector<16x256xf32> to vector<2x256xf32>
    %151 = arith.addf %149, %150 : vector<2x256xf32>
    %152 = math.tanh %151 : vector<2x256xf32>
    %cst_29 = arith.constant 5.000000e-01 : f32
    %153 = vector.broadcast %cst_29 : f32 to vector<2x256xf32>
    %154 = arith.mulf %153, %152 : vector<2x256xf32>
    %cst_30 = arith.constant 5.000000e-01 : f32
    %155 = vector.broadcast %cst_30 : f32 to vector<2x256xf32>
    %156 = arith.addf %154, %155 : vector<2x256xf32>
    %157 = vector.extract_strided_slice %156 {offsets = [0, 0], sizes = [2, 64], strides = [1, 1]} : vector<2x256xf32> to vector<2x64xf32>
    %158 = vector.extract_strided_slice %156 {offsets = [0, 64], sizes = [2, 64], strides = [1, 1]} : vector<2x256xf32> to vector<2x64xf32>
    %159 = vector.extract_strided_slice %152 {offsets = [0, 128], sizes = [2, 64], strides = [1, 1]} : vector<2x256xf32> to vector<2x64xf32>
    %160 = vector.extract_strided_slice %156 {offsets = [0, 192], sizes = [2, 64], strides = [1, 1]} : vector<2x256xf32> to vector<2x64xf32>
    %161 = arith.mulf %158, %145 : vector<2x64xf32>
    %162 = arith.mulf %157, %159 : vector<2x64xf32>
    %163 = arith.addf %161, %162 : vector<2x64xf32>
    %164 = math.tanh %163 : vector<2x64xf32>
    %165 = arith.mulf %160, %164 : vector<2x64xf32>
    %166 = vector.extract_strided_slice %165 {offsets = [0, 32], sizes = [2, 32], strides = [1, 1]} : vector<2x64xf32> to vector<2x32xf32>
    %cst_31 = arith.constant dense<0.000000e+00> : vector<2x256xf32>
    %167 = tpu.matmul %165, %5, %cst_31 {dimension_numbers = #tpu.dot_dimension_numbers<[1], [0], [0], [1], [0, 0, 1, 1], [], []>} : vector<2x64xf32>, vector<64x256xf32>, vector<2x256xf32> -> vector<2x256xf32>
    %168 = vector.extract_strided_slice %14 {offsets = [14, 0], sizes = [2, 256], strides = [1, 1]} : vector<16x256xf32> to vector<2x256xf32>
    %169 = arith.addf %167, %168 : vector<2x256xf32>
    %170 = math.tanh %169 : vector<2x256xf32>
    %cst_32 = arith.constant 5.000000e-01 : f32
    %171 = vector.broadcast %cst_32 : f32 to vector<2x256xf32>
    %172 = arith.mulf %171, %170 : vector<2x256xf32>
    %cst_33 = arith.constant 5.000000e-01 : f32
    %173 = vector.broadcast %cst_33 : f32 to vector<2x256xf32>
    %174 = arith.addf %172, %173 : vector<2x256xf32>
    %175 = vector.extract_strided_slice %174 {offsets = [0, 0], sizes = [2, 64], strides = [1, 1]} : vector<2x256xf32> to vector<2x64xf32>
    %176 = vector.extract_strided_slice %174 {offsets = [0, 64], sizes = [2, 64], strides = [1, 1]} : vector<2x256xf32> to vector<2x64xf32>
    %177 = vector.extract_strided_slice %170 {offsets = [0, 128], sizes = [2, 64], strides = [1, 1]} : vector<2x256xf32> to vector<2x64xf32>
    %178 = vector.extract_strided_slice %174 {offsets = [0, 192], sizes = [2, 64], strides = [1, 1]} : vector<2x256xf32> to vector<2x64xf32>
    %179 = arith.mulf %176, %163 : vector<2x64xf32>
    %180 = arith.mulf %175, %177 : vector<2x64xf32>
    %181 = arith.addf %179, %180 : vector<2x64xf32>
    %182 = math.tanh %181 : vector<2x64xf32>
    %183 = arith.mulf %178, %182 : vector<2x64xf32>
    %184 = vector.extract_strided_slice %183 {offsets = [0, 32], sizes = [2, 32], strides = [1, 1]} : vector<2x64xf32> to vector<2x32xf32>
    %185 = vector.extract_strided_slice %183 {offsets = [0, 32], sizes = [2, 32], strides = [1, 1]} : vector<2x64xf32> to vector<2x32xf32>
    %186 = vector.extract_strided_slice %181 {offsets = [0, 32], sizes = [2, 32], strides = [1, 1]} : vector<2x64xf32> to vector<2x32xf32>
    %187 = vector.extract_strided_slice %0 {offsets = [16, 0], sizes = [16, 16], strides = [1, 1]} : vector<32x16xf32> to vector<16x16xf32>
    %cst_34 = arith.constant dense<0.000000e+00> : vector<16x128xf32>
    %188 = tpu.matmul %187, %6, %cst_34 {dimension_numbers = #tpu.dot_dimension_numbers<[1], [0], [0], [1], [0, 0, 1, 1], [], []>} : vector<16x16xf32>, vector<16x128xf32>, vector<16x128xf32> -> vector<16x128xf32>
    %189 = arith.addf %188, %7 : vector<16x128xf32>
    %cst_35 = arith.constant dense<0.000000e+00> : vector<2x128xf32>
    %190 = tpu.matmul %185, %8, %cst_35 {dimension_numbers = #tpu.dot_dimension_numbers<[1], [0], [0], [1], [0, 0, 1, 1], [], []>} : vector<2x32xf32>, vector<32x128xf32>, vector<2x128xf32> -> vector<2x128xf32>
    %191 = vector.extract_strided_slice %189 {offsets = [0, 0], sizes = [2, 128], strides = [1, 1]} : vector<16x128xf32> to vector<2x128xf32>
    %192 = arith.addf %190, %191 : vector<2x128xf32>
    %193 = math.tanh %192 : vector<2x128xf32>
    %cst_36 = arith.constant 5.000000e-01 : f32
    %194 = vector.broadcast %cst_36 : f32 to vector<2x128xf32>
    %195 = arith.mulf %194, %193 : vector<2x128xf32>
    %cst_37 = arith.constant 5.000000e-01 : f32
    %196 = vector.broadcast %cst_37 : f32 to vector<2x128xf32>
    %197 = arith.addf %195, %196 : vector<2x128xf32>
    %198 = vector.extract_strided_slice %197 {offsets = [0, 0], sizes = [2, 32], strides = [1, 1]} : vector<2x128xf32> to vector<2x32xf32>
    %199 = vector.extract_strided_slice %197 {offsets = [0, 32], sizes = [2, 32], strides = [1, 1]} : vector<2x128xf32> to vector<2x32xf32>
    %200 = vector.extract_strided_slice %193 {offsets = [0, 64], sizes = [2, 32], strides = [1, 1]} : vector<2x128xf32> to vector<2x32xf32>
    %201 = vector.extract_strided_slice %197 {offsets = [0, 96], sizes = [2, 32], strides = [1, 1]} : vector<2x128xf32> to vector<2x32xf32>
    %202 = arith.mulf %199, %186 : vector<2x32xf32>
    %203 = arith.mulf %198, %200 : vector<2x32xf32>
    %204 = arith.addf %202, %203 : vector<2x32xf32>
    %205 = math.tanh %204 : vector<2x32xf32>
    %206 = arith.mulf %201, %205 : vector<2x32xf32>
    %cst_38 = arith.constant dense<0.000000e+00> : vector<2x128xf32>
    %207 = tpu.matmul %206, %8, %cst_38 {dimension_numbers = #tpu.dot_dimension_numbers<[1], [0], [0], [1], [0, 0, 1, 1], [], []>} : vector<2x32xf32>, vector<32x128xf32>, vector<2x128xf32> -> vector<2x128xf32>
    %208 = vector.extract_strided_slice %189 {offsets = [2, 0], sizes = [2, 128], strides = [1, 1]} : vector<16x128xf32> to vector<2x128xf32>
    %209 = arith.addf %207, %208 : vector<2x128xf32>
    %210 = math.tanh %209 : vector<2x128xf32>
    %cst_39 = arith.constant 5.000000e-01 : f32
    %211 = vector.broadcast %cst_39 : f32 to vector<2x128xf32>
    %212 = arith.mulf %211, %210 : vector<2x128xf32>
    %cst_40 = arith.constant 5.000000e-01 : f32
    %213 = vector.broadcast %cst_40 : f32 to vector<2x128xf32>
    %214 = arith.addf %212, %213 : vector<2x128xf32>
    %215 = vector.extract_strided_slice %214 {offsets = [0, 0], sizes = [2, 32], strides = [1, 1]} : vector<2x128xf32> to vector<2x32xf32>
    %216 = vector.extract_strided_slice %214 {offsets = [0, 32], sizes = [2, 32], strides = [1, 1]} : vector<2x128xf32> to vector<2x32xf32>
    %217 = vector.extract_strided_slice %210 {offsets = [0, 64], sizes = [2, 32], strides = [1, 1]} : vector<2x128xf32> to vector<2x32xf32>
    %218 = vector.extract_strided_slice %214 {offsets = [0, 96], sizes = [2, 32], strides = [1, 1]} : vector<2x128xf32> to vector<2x32xf32>
    %219 = arith.mulf %216, %204 : vector<2x32xf32>
    %220 = arith.mulf %215, %217 : vector<2x32xf32>
    %221 = arith.addf %219, %220 : vector<2x32xf32>
    %222 = math.tanh %221 : vector<2x32xf32>
    %223 = arith.mulf %218, %222 : vector<2x32xf32>
    %cst_41 = arith.constant dense<0.000000e+00> : vector<2x128xf32>
    %224 = tpu.matmul %223, %8, %cst_41 {dimension_numbers = #tpu.dot_dimension_numbers<[1], [0], [0], [1], [0, 0, 1, 1], [], []>} : vector<2x32xf32>, vector<32x128xf32>, vector<2x128xf32> -> vector<2x128xf32>
    %225 = vector.extract_strided_slice %189 {offsets = [4, 0], sizes = [2, 128], strides = [1, 1]} : vector<16x128xf32> to vector<2x128xf32>
    %226 = arith.addf %224, %225 : vector<2x128xf32>
    %227 = math.tanh %226 : vector<2x128xf32>
    %cst_42 = arith.constant 5.000000e-01 : f32
    %228 = vector.broadcast %cst_42 : f32 to vector<2x128xf32>
    %229 = arith.mulf %228, %227 : vector<2x128xf32>
    %cst_43 = arith.constant 5.000000e-01 : f32
    %230 = vector.broadcast %cst_43 : f32 to vector<2x128xf32>
    %231 = arith.addf %229, %230 : vector<2x128xf32>
    %232 = vector.extract_strided_slice %231 {offsets = [0, 0], sizes = [2, 32], strides = [1, 1]} : vector<2x128xf32> to vector<2x32xf32>
    %233 = vector.extract_strided_slice %231 {offsets = [0, 32], sizes = [2, 32], strides = [1, 1]} : vector<2x128xf32> to vector<2x32xf32>
    %234 = vector.extract_strided_slice %227 {offsets = [0, 64], sizes = [2, 32], strides = [1, 1]} : vector<2x128xf32> to vector<2x32xf32>
    %235 = vector.extract_strided_slice %231 {offsets = [0, 96], sizes = [2, 32], strides = [1, 1]} : vector<2x128xf32> to vector<2x32xf32>
    %236 = arith.mulf %233, %221 : vector<2x32xf32>
    %237 = arith.mulf %232, %234 : vector<2x32xf32>
    %238 = arith.addf %236, %237 : vector<2x32xf32>
    %239 = math.tanh %238 : vector<2x32xf32>
    %240 = arith.mulf %235, %239 : vector<2x32xf32>
    %cst_44 = arith.constant dense<0.000000e+00> : vector<2x128xf32>
    %241 = tpu.matmul %240, %8, %cst_44 {dimension_numbers = #tpu.dot_dimension_numbers<[1], [0], [0], [1], [0, 0, 1, 1], [], []>} : vector<2x32xf32>, vector<32x128xf32>, vector<2x128xf32> -> vector<2x128xf32>
    %242 = vector.extract_strided_slice %189 {offsets = [6, 0], sizes = [2, 128], strides = [1, 1]} : vector<16x128xf32> to vector<2x128xf32>
    %243 = arith.addf %241, %242 : vector<2x128xf32>
    %244 = math.tanh %243 : vector<2x128xf32>
    %cst_45 = arith.constant 5.000000e-01 : f32
    %245 = vector.broadcast %cst_45 : f32 to vector<2x128xf32>
    %246 = arith.mulf %245, %244 : vector<2x128xf32>
    %cst_46 = arith.constant 5.000000e-01 : f32
    %247 = vector.broadcast %cst_46 : f32 to vector<2x128xf32>
    %248 = arith.addf %246, %247 : vector<2x128xf32>
    %249 = vector.extract_strided_slice %248 {offsets = [0, 0], sizes = [2, 32], strides = [1, 1]} : vector<2x128xf32> to vector<2x32xf32>
    %250 = vector.extract_strided_slice %248 {offsets = [0, 32], sizes = [2, 32], strides = [1, 1]} : vector<2x128xf32> to vector<2x32xf32>
    %251 = vector.extract_strided_slice %244 {offsets = [0, 64], sizes = [2, 32], strides = [1, 1]} : vector<2x128xf32> to vector<2x32xf32>
    %252 = vector.extract_strided_slice %248 {offsets = [0, 96], sizes = [2, 32], strides = [1, 1]} : vector<2x128xf32> to vector<2x32xf32>
    %253 = arith.mulf %250, %238 : vector<2x32xf32>
    %254 = arith.mulf %249, %251 : vector<2x32xf32>
    %255 = arith.addf %253, %254 : vector<2x32xf32>
    %256 = math.tanh %255 : vector<2x32xf32>
    %257 = arith.mulf %252, %256 : vector<2x32xf32>
    %cst_47 = arith.constant dense<0.000000e+00> : vector<2x128xf32>
    %258 = tpu.matmul %257, %8, %cst_47 {dimension_numbers = #tpu.dot_dimension_numbers<[1], [0], [0], [1], [0, 0, 1, 1], [], []>} : vector<2x32xf32>, vector<32x128xf32>, vector<2x128xf32> -> vector<2x128xf32>
    %259 = vector.extract_strided_slice %189 {offsets = [8, 0], sizes = [2, 128], strides = [1, 1]} : vector<16x128xf32> to vector<2x128xf32>
    %260 = arith.addf %258, %259 : vector<2x128xf32>
    %261 = math.tanh %260 : vector<2x128xf32>
    %cst_48 = arith.constant 5.000000e-01 : f32
    %262 = vector.broadcast %cst_48 : f32 to vector<2x128xf32>
    %263 = arith.mulf %262, %261 : vector<2x128xf32>
    %cst_49 = arith.constant 5.000000e-01 : f32
    %264 = vector.broadcast %cst_49 : f32 to vector<2x128xf32>
    %265 = arith.addf %263, %264 : vector<2x128xf32>
    %266 = vector.extract_strided_slice %265 {offsets = [0, 0], sizes = [2, 32], strides = [1, 1]} : vector<2x128xf32> to vector<2x32xf32>
    %267 = vector.extract_strided_slice %265 {offsets = [0, 32], sizes = [2, 32], strides = [1, 1]} : vector<2x128xf32> to vector<2x32xf32>
    %268 = vector.extract_strided_slice %261 {offsets = [0, 64], sizes = [2, 32], strides = [1, 1]} : vector<2x128xf32> to vector<2x32xf32>
    %269 = vector.extract_strided_slice %265 {offsets = [0, 96], sizes = [2, 32], strides = [1, 1]} : vector<2x128xf32> to vector<2x32xf32>
    %270 = arith.mulf %267, %255 : vector<2x32xf32>
    %271 = arith.mulf %266, %268 : vector<2x32xf32>
    %272 = arith.addf %270, %271 : vector<2x32xf32>
    %273 = math.tanh %272 : vector<2x32xf32>
    %274 = arith.mulf %269, %273 : vector<2x32xf32>
    %cst_50 = arith.constant dense<0.000000e+00> : vector<2x128xf32>
    %275 = tpu.matmul %274, %8, %cst_50 {dimension_numbers = #tpu.dot_dimension_numbers<[1], [0], [0], [1], [0, 0, 1, 1], [], []>} : vector<2x32xf32>, vector<32x128xf32>, vector<2x128xf32> -> vector<2x128xf32>
    %276 = vector.extract_strided_slice %189 {offsets = [10, 0], sizes = [2, 128], strides = [1, 1]} : vector<16x128xf32> to vector<2x128xf32>
    %277 = arith.addf %275, %276 : vector<2x128xf32>
    %278 = math.tanh %277 : vector<2x128xf32>
    %cst_51 = arith.constant 5.000000e-01 : f32
    %279 = vector.broadcast %cst_51 : f32 to vector<2x128xf32>
    %280 = arith.mulf %279, %278 : vector<2x128xf32>
    %cst_52 = arith.constant 5.000000e-01 : f32
    %281 = vector.broadcast %cst_52 : f32 to vector<2x128xf32>
    %282 = arith.addf %280, %281 : vector<2x128xf32>
    %283 = vector.extract_strided_slice %282 {offsets = [0, 0], sizes = [2, 32], strides = [1, 1]} : vector<2x128xf32> to vector<2x32xf32>
    %284 = vector.extract_strided_slice %282 {offsets = [0, 32], sizes = [2, 32], strides = [1, 1]} : vector<2x128xf32> to vector<2x32xf32>
    %285 = vector.extract_strided_slice %278 {offsets = [0, 64], sizes = [2, 32], strides = [1, 1]} : vector<2x128xf32> to vector<2x32xf32>
    %286 = vector.extract_strided_slice %282 {offsets = [0, 96], sizes = [2, 32], strides = [1, 1]} : vector<2x128xf32> to vector<2x32xf32>
    %287 = arith.mulf %284, %272 : vector<2x32xf32>
    %288 = arith.mulf %283, %285 : vector<2x32xf32>
    %289 = arith.addf %287, %288 : vector<2x32xf32>
    %290 = math.tanh %289 : vector<2x32xf32>
    %291 = arith.mulf %286, %290 : vector<2x32xf32>
    %cst_53 = arith.constant dense<0.000000e+00> : vector<2x128xf32>
    %292 = tpu.matmul %291, %8, %cst_53 {dimension_numbers = #tpu.dot_dimension_numbers<[1], [0], [0], [1], [0, 0, 1, 1], [], []>} : vector<2x32xf32>, vector<32x128xf32>, vector<2x128xf32> -> vector<2x128xf32>
    %293 = vector.extract_strided_slice %189 {offsets = [12, 0], sizes = [2, 128], strides = [1, 1]} : vector<16x128xf32> to vector<2x128xf32>
    %294 = arith.addf %292, %293 : vector<2x128xf32>
    %295 = math.tanh %294 : vector<2x128xf32>
    %cst_54 = arith.constant 5.000000e-01 : f32
    %296 = vector.broadcast %cst_54 : f32 to vector<2x128xf32>
    %297 = arith.mulf %296, %295 : vector<2x128xf32>
    %cst_55 = arith.constant 5.000000e-01 : f32
    %298 = vector.broadcast %cst_55 : f32 to vector<2x128xf32>
    %299 = arith.addf %297, %298 : vector<2x128xf32>
    %300 = vector.extract_strided_slice %299 {offsets = [0, 0], sizes = [2, 32], strides = [1, 1]} : vector<2x128xf32> to vector<2x32xf32>
    %301 = vector.extract_strided_slice %299 {offsets = [0, 32], sizes = [2, 32], strides = [1, 1]} : vector<2x128xf32> to vector<2x32xf32>
    %302 = vector.extract_strided_slice %295 {offsets = [0, 64], sizes = [2, 32], strides = [1, 1]} : vector<2x128xf32> to vector<2x32xf32>
    %303 = vector.extract_strided_slice %299 {offsets = [0, 96], sizes = [2, 32], strides = [1, 1]} : vector<2x128xf32> to vector<2x32xf32>
    %304 = arith.mulf %301, %289 : vector<2x32xf32>
    %305 = arith.mulf %300, %302 : vector<2x32xf32>
    %306 = arith.addf %304, %305 : vector<2x32xf32>
    %307 = math.tanh %306 : vector<2x32xf32>
    %308 = arith.mulf %303, %307 : vector<2x32xf32>
    %cst_56 = arith.constant dense<0.000000e+00> : vector<2x128xf32>
    %309 = tpu.matmul %308, %8, %cst_56 {dimension_numbers = #tpu.dot_dimension_numbers<[1], [0], [0], [1], [0, 0, 1, 1], [], []>} : vector<2x32xf32>, vector<32x128xf32>, vector<2x128xf32> -> vector<2x128xf32>
    %310 = vector.extract_strided_slice %189 {offsets = [14, 0], sizes = [2, 128], strides = [1, 1]} : vector<16x128xf32> to vector<2x128xf32>
    %311 = arith.addf %309, %310 : vector<2x128xf32>
    %312 = math.tanh %311 : vector<2x128xf32>
    %cst_57 = arith.constant 5.000000e-01 : f32
    %313 = vector.broadcast %cst_57 : f32 to vector<2x128xf32>
    %314 = arith.mulf %313, %312 : vector<2x128xf32>
    %cst_58 = arith.constant 5.000000e-01 : f32
    %315 = vector.broadcast %cst_58 : f32 to vector<2x128xf32>
    %316 = arith.addf %314, %315 : vector<2x128xf32>
    %317 = vector.extract_strided_slice %316 {offsets = [0, 0], sizes = [2, 32], strides = [1, 1]} : vector<2x128xf32> to vector<2x32xf32>
    %318 = vector.extract_strided_slice %316 {offsets = [0, 32], sizes = [2, 32], strides = [1, 1]} : vector<2x128xf32> to vector<2x32xf32>
    %319 = vector.extract_strided_slice %312 {offsets = [0, 64], sizes = [2, 32], strides = [1, 1]} : vector<2x128xf32> to vector<2x32xf32>
    %320 = vector.extract_strided_slice %316 {offsets = [0, 96], sizes = [2, 32], strides = [1, 1]} : vector<2x128xf32> to vector<2x32xf32>
    %321 = arith.mulf %318, %306 : vector<2x32xf32>
    %322 = arith.mulf %317, %319 : vector<2x32xf32>
    %323 = arith.addf %321, %322 : vector<2x32xf32>
    %324 = math.tanh %323 : vector<2x32xf32>
    %325 = arith.mulf %320, %324 : vector<2x32xf32>
    %326 = vector.extract_strided_slice %58 {offsets = [0, 0], sizes = [1, 32], strides = [1, 1]} : vector<2x32xf32> to vector<1x32xf32>
    %327 = vector.extract_strided_slice %76 {offsets = [0, 0], sizes = [1, 32], strides = [1, 1]} : vector<2x32xf32> to vector<1x32xf32>
    %328 = vector.extract_strided_slice %94 {offsets = [0, 0], sizes = [1, 32], strides = [1, 1]} : vector<2x32xf32> to vector<1x32xf32>
    %329 = vector.extract_strided_slice %112 {offsets = [0, 0], sizes = [1, 32], strides = [1, 1]} : vector<2x32xf32> to vector<1x32xf32>
    %330 = vector.extract_strided_slice %130 {offsets = [0, 0], sizes = [1, 32], strides = [1, 1]} : vector<2x32xf32> to vector<1x32xf32>
    %331 = vector.extract_strided_slice %148 {offsets = [0, 0], sizes = [1, 32], strides = [1, 1]} : vector<2x32xf32> to vector<1x32xf32>
    %332 = vector.extract_strided_slice %166 {offsets = [0, 0], sizes = [1, 32], strides = [1, 1]} : vector<2x32xf32> to vector<1x32xf32>
    %333 = vector.extract_strided_slice %184 {offsets = [0, 0], sizes = [1, 32], strides = [1, 1]} : vector<2x32xf32> to vector<1x32xf32>
    %334 = tpu.concatenate %326, %327, %328, %329, %330, %331, %332, %333 in 0 : vector<1x32xf32>, vector<1x32xf32>, vector<1x32xf32>, vector<1x32xf32>, vector<1x32xf32>, vector<1x32xf32>, vector<1x32xf32>, vector<1x32xf32> -> vector<8x32xf32>
    %335 = vector.extract_strided_slice %206 {offsets = [0, 0], sizes = [1, 32], strides = [1, 1]} : vector<2x32xf32> to vector<1x32xf32>
    %336 = vector.extract_strided_slice %223 {offsets = [0, 0], sizes = [1, 32], strides = [1, 1]} : vector<2x32xf32> to vector<1x32xf32>
    %337 = vector.extract_strided_slice %240 {offsets = [0, 0], sizes = [1, 32], strides = [1, 1]} : vector<2x32xf32> to vector<1x32xf32>
    %338 = vector.extract_strided_slice %257 {offsets = [0, 0], sizes = [1, 32], strides = [1, 1]} : vector<2x32xf32> to vector<1x32xf32>
    %339 = vector.extract_strided_slice %274 {offsets = [0, 0], sizes = [1, 32], strides = [1, 1]} : vector<2x32xf32> to vector<1x32xf32>
    %340 = vector.extract_strided_slice %291 {offsets = [0, 0], sizes = [1, 32], strides = [1, 1]} : vector<2x32xf32> to vector<1x32xf32>
    %341 = vector.extract_strided_slice %308 {offsets = [0, 0], sizes = [1, 32], strides = [1, 1]} : vector<2x32xf32> to vector<1x32xf32>
    %342 = vector.extract_strided_slice %325 {offsets = [0, 0], sizes = [1, 32], strides = [1, 1]} : vector<2x32xf32> to vector<1x32xf32>
    %343 = tpu.concatenate %335, %336, %337, %338, %339, %340, %341, %342 in 0 : vector<1x32xf32>, vector<1x32xf32>, vector<1x32xf32>, vector<1x32xf32>, vector<1x32xf32>, vector<1x32xf32>, vector<1x32xf32>, vector<1x32xf32> -> vector<8x32xf32>
    %cst_59 = arith.constant dense<0.000000e+00> : vector<8x8xf32>
    %344 = tpu.matmul %343, %334, %cst_59 {dimension_numbers = #tpu.dot_dimension_numbers<[1], [1], [0], [0], [0, 0, 1, 0], [], []>} : vector<8x32xf32>, vector<8x32xf32>, vector<8x8xf32> -> vector<8x8xf32>
    %cst_60 = arith.constant dense<0xFF800000> : vector<8xf32>
    %345 = vector.multi_reduction <maximumf>, %344, %cst_60 [1] : vector<8x8xf32> to vector<8xf32>
    %346 = vector.shape_cast %345 : vector<8xf32> to vector<8x1xf32>
    %347 = vector.broadcast %346 : vector<8x1xf32> to vector<8x8xf32>
    %348 = arith.subf %344, %347 : vector<8x8xf32>
    %349 = math.exp %348 : vector<8x8xf32>
    %cst_61 = arith.constant dense<0.000000e+00> : vector<8xf32>
    %350 = vector.multi_reduction <add>, %349, %cst_61 [1] : vector<8x8xf32> to vector<8xf32>
    %351 = vector.shape_cast %350 : vector<8xf32> to vector<8x1xf32>
    %352 = vector.broadcast %351 : vector<8x1xf32> to vector<8x8xf32>
    %353 = arith.divf %349, %352 : vector<8x8xf32>
    %cst_62 = arith.constant dense<0.000000e+00> : vector<8x32xf32>
    %354 = tpu.matmul %353, %334, %cst_62 {dimension_numbers = #tpu.dot_dimension_numbers<[1], [0], [0], [1], [0, 0, 1, 1], [], []>} : vector<8x8xf32>, vector<8x32xf32>, vector<8x32xf32> -> vector<8x32xf32>
    %cst_63 = arith.constant dense<0.000000e+00> : vector<8x4xf32>
    %355 = tpu.matmul %354, %9, %cst_63 {dimension_numbers = #tpu.dot_dimension_numbers<[1], [0], [0], [1], [0, 0, 1, 1], [], []>} : vector<8x32xf32>, vector<32x4xf32>, vector<8x4xf32> -> vector<8x4xf32>
    %cst_64 = arith.constant dense<0.000000e+00> : vector<8x4xf32>
    %356 = tpu.matmul %343, %10, %cst_64 {dimension_numbers = #tpu.dot_dimension_numbers<[1], [0], [0], [1], [0, 0, 1, 1], [], []>} : vector<8x32xf32>, vector<32x4xf32>, vector<8x4xf32> -> vector<8x4xf32>
    %357 = arith.addf %355, %356 : vector<8x4xf32>
    %358 = vector.broadcast %11 : vector<1x4xf32> to vector<8x4xf32>
    %359 = arith.addf %357, %358 : vector<8x4xf32>
    %c0_65 = arith.constant 0 : index
    %c0_66 = arith.constant 0 : index
    %360 = vector.load %arg3[%c0_65, %c0_66] : memref<16x4xf32, #tpu.memory_space<vmem>>, vector<8x4xf32>
    tpu.vector_store %arg3[%c0_65, %c0_66], %359 {strides = array<i32>} : memref<16x4xf32, #tpu.memory_space<vmem>>, vector<8x4xf32>,
    %361 = vector.extract_strided_slice %58 {offsets = [1, 0], sizes = [1, 32], strides = [1, 1]} : vector<2x32xf32> to vector<1x32xf32>
    %362 = vector.extract_strided_slice %76 {offsets = [1, 0], sizes = [1, 32], strides = [1, 1]} : vector<2x32xf32> to vector<1x32xf32>
    %363 = vector.extract_strided_slice %94 {offsets = [1, 0], sizes = [1, 32], strides = [1, 1]} : vector<2x32xf32> to vector<1x32xf32>
    %364 = vector.extract_strided_slice %112 {offsets = [1, 0], sizes = [1, 32], strides = [1, 1]} : vector<2x32xf32> to vector<1x32xf32>
    %365 = vector.extract_strided_slice %130 {offsets = [1, 0], sizes = [1, 32], strides = [1, 1]} : vector<2x32xf32> to vector<1x32xf32>
    %366 = vector.extract_strided_slice %148 {offsets = [1, 0], sizes = [1, 32], strides = [1, 1]} : vector<2x32xf32> to vector<1x32xf32>
    %367 = vector.extract_strided_slice %166 {offsets = [1, 0], sizes = [1, 32], strides = [1, 1]} : vector<2x32xf32> to vector<1x32xf32>
    %368 = vector.extract_strided_slice %184 {offsets = [1, 0], sizes = [1, 32], strides = [1, 1]} : vector<2x32xf32> to vector<1x32xf32>
    %369 = tpu.concatenate %361, %362, %363, %364, %365, %366, %367, %368 in 0 : vector<1x32xf32>, vector<1x32xf32>, vector<1x32xf32>, vector<1x32xf32>, vector<1x32xf32>, vector<1x32xf32>, vector<1x32xf32>, vector<1x32xf32> -> vector<8x32xf32>
    %370 = vector.extract_strided_slice %206 {offsets = [1, 0], sizes = [1, 32], strides = [1, 1]} : vector<2x32xf32> to vector<1x32xf32>
    %371 = vector.extract_strided_slice %223 {offsets = [1, 0], sizes = [1, 32], strides = [1, 1]} : vector<2x32xf32> to vector<1x32xf32>
    %372 = vector.extract_strided_slice %240 {offsets = [1, 0], sizes = [1, 32], strides = [1, 1]} : vector<2x32xf32> to vector<1x32xf32>
    %373 = vector.extract_strided_slice %257 {offsets = [1, 0], sizes = [1, 32], strides = [1, 1]} : vector<2x32xf32> to vector<1x32xf32>
    %374 = vector.extract_strided_slice %274 {offsets = [1, 0], sizes = [1, 32], strides = [1, 1]} : vector<2x32xf32> to vector<1x32xf32>
    %375 = vector.extract_strided_slice %291 {offsets = [1, 0], sizes = [1, 32], strides = [1, 1]} : vector<2x32xf32> to vector<1x32xf32>
    %376 = vector.extract_strided_slice %308 {offsets = [1, 0], sizes = [1, 32], strides = [1, 1]} : vector<2x32xf32> to vector<1x32xf32>
    %377 = vector.extract_strided_slice %325 {offsets = [1, 0], sizes = [1, 32], strides = [1, 1]} : vector<2x32xf32> to vector<1x32xf32>
    %378 = tpu.concatenate %370, %371, %372, %373, %374, %375, %376, %377 in 0 : vector<1x32xf32>, vector<1x32xf32>, vector<1x32xf32>, vector<1x32xf32>, vector<1x32xf32>, vector<1x32xf32>, vector<1x32xf32>, vector<1x32xf32> -> vector<8x32xf32>
    %cst_67 = arith.constant dense<0.000000e+00> : vector<8x8xf32>
    %379 = tpu.matmul %378, %369, %cst_67 {dimension_numbers = #tpu.dot_dimension_numbers<[1], [1], [0], [0], [0, 0, 1, 0], [], []>} : vector<8x32xf32>, vector<8x32xf32>, vector<8x8xf32> -> vector<8x8xf32>
    %cst_68 = arith.constant dense<0xFF800000> : vector<8xf32>
    %380 = vector.multi_reduction <maximumf>, %379, %cst_68 [1] : vector<8x8xf32> to vector<8xf32>
    %381 = vector.shape_cast %380 : vector<8xf32> to vector<8x1xf32>
    %382 = vector.broadcast %381 : vector<8x1xf32> to vector<8x8xf32>
    %383 = arith.subf %379, %382 : vector<8x8xf32>
    %384 = math.exp %383 : vector<8x8xf32>
    %cst_69 = arith.constant dense<0.000000e+00> : vector<8xf32>
    %385 = vector.multi_reduction <add>, %384, %cst_69 [1] : vector<8x8xf32> to vector<8xf32>
    %386 = vector.shape_cast %385 : vector<8xf32> to vector<8x1xf32>
    %387 = vector.broadcast %386 : vector<8x1xf32> to vector<8x8xf32>
    %388 = arith.divf %384, %387 : vector<8x8xf32>
    %cst_70 = arith.constant dense<0.000000e+00> : vector<8x32xf32>
    %389 = tpu.matmul %388, %369, %cst_70 {dimension_numbers = #tpu.dot_dimension_numbers<[1], [0], [0], [1], [0, 0, 1, 1], [], []>} : vector<8x8xf32>, vector<8x32xf32>, vector<8x32xf32> -> vector<8x32xf32>
    %cst_71 = arith.constant dense<0.000000e+00> : vector<8x4xf32>
    %390 = tpu.matmul %389, %9, %cst_71 {dimension_numbers = #tpu.dot_dimension_numbers<[1], [0], [0], [1], [0, 0, 1, 1], [], []>} : vector<8x32xf32>, vector<32x4xf32>, vector<8x4xf32> -> vector<8x4xf32>
    %cst_72 = arith.constant dense<0.000000e+00> : vector<8x4xf32>
    %391 = tpu.matmul %378, %10, %cst_72 {dimension_numbers = #tpu.dot_dimension_numbers<[1], [0], [0], [1], [0, 0, 1, 1], [], []>} : vector<8x32xf32>, vector<32x4xf32>, vector<8x4xf32> -> vector<8x4xf32>
    %392 = arith.addf %390, %391 : vector<8x4xf32>
    %393 = vector.broadcast %11 : vector<1x4xf32> to vector<8x4xf32>
    %394 = arith.addf %392, %393 : vector<8x4xf32>
    %c8 = arith.constant 8 : index
    %c0_73 = arith.constant 0 : index
    %395 = vector.load %arg3[%c8, %c0_73] : memref<16x4xf32, #tpu.memory_space<vmem>>, vector<8x4xf32>
    tpu.vector_store %arg3[%c8, %c0_73], %394 {strides = array<i32>} : memref<16x4xf32, #tpu.memory_space<vmem>>, vector<8x4xf32>,
    return
  }
}

</mosaic_0001>

<bundles_post_ra>
// kernel: model_forward.1
= control target key start
LH: loop header
LB: loop body
LE: loop exit
PB: predicated region body
PF: predicated region fallthrough
CT: control target
= control target key end

     0   :  { %v3168_v3 = vmov 0.0   ;;  %vm59_vm0 = vcmask 130048   ;;  %v143_v42 = vlaneseq  ;;  %s3169_s4 = smov 64   ;;  %vm148_vm2 = vcmask 523264   ;;  %s3697_s1 = inlined_call_operand.vmem [shape: f32[96,256], index: 1, kind: input, shape index: {}]   ;;  %s3698_s0 = inlined_call_operand.vmem [shape: f32[32,16], index: 0, kind: input, shape index: {}]   ;;  %s3699_s2 = inlined_call_operand.vmem [shape: f32[129,128], index: 2, kind: input, shape index: {}]   ;;  %s3700_s3 = inlined_call_operand.vmem [shape: f32[16,4], index: 3, kind: output, shape index: {}]  }
   0x1   :  { %v27_v0 = vld [vmem:[%s3697_s1 + $0x48] sm:$0xff]  ;;  %v29_v1 = vld [vmem:[%s3697_s1 + $0x58] sm:$0xff]  ;;  %v26_v2 = vld [vmem:[%s3697_s1 + $0x40] sm:$0xff]  ;;  %130 = vmatprep.mubr.f32.mxu0 %v3168_v3  ;;  %216 = vmatprep.mubr.f32.mxu1 %v3168_v3  ;;  %vm1874_vm3 = vcmask 1040384   ;;  %vm1876_vm4 = vcmask 1041408   ;;  %vm1878_vm5 = vcmask 1042432  }
   0x2   :  { %v3204_v4 = vpack.c.bf16 %v29_v1, %v27_v0  ;;  %v28_v5 = vld [vmem:[%s3697_s1 + $0x50] sm:$0xff]  ;;  %v31_v6 = vld [vmem:[%s3697_s1 + $0x68] sm:$0xff]  ;;  %v33_v7 = vld [vmem:[%s3697_s1 + $0x78] sm:$0xff]  ;;  %v144_v45 = vand.u32 127, %v143_v42  ;;  %vm1880_vm6 = vcmask 1043456   ;;  %vm1882_vm7 = vcmask 1044480  }
   0x3   :  { %v3215_v8 = vpack.c.bf16 %v28_v5, %v26_v2  ;;  %v3217_v9 = vpack.c.bf16 %v33_v7, %v31_v6  ;;  %v30_v10 = vld [vmem:[%s3697_s1 + $0x60] sm:$0xff]  ;;  %v32_v11 = vld [vmem:[%s3697_s1 + $0x70] sm:$0xff]  ;;  %v35_v12 = vld [vmem:[%s3697_s1 + $0x88] sm:$0xff]  ;;  %vm1884_vm8 = vcmask 1045504   ;;  %vm3171_vm9 = vmmov 0  }
   0x4   :  { %2850 = vmatprep.subr.bf16.mxu1 %v3204_v4  ;;  %v37_v13 = vld [vmem:[%s3697_s1 + $0x98] sm:$0xff]  ;;  %v19_v14 = vld [vmem:[%s3697_s1 + $0x8] sm:$0xff]  ;;  %v3239_v16 = vpack.c.bf16 %v32_v11, %v30_v10  ;;  %v18_v18 = vld [vmem:[%s3697_s1] sm:$0xff]  ;;  %vm145_vm1 = vcmp.lt.s32.totalorder %v144_v45, 32  ;;  %vm1886_vm10 = vcmask 1046528   ;;  %vm1084_vm11 = vcmask 261120  }
   0x5   :  { %v21_v15 = vld [vmem:[%s3697_s1 + $0x18] sm:$0xff]  ;;  %2852 = vmatpush1.bf16.msra.mxu1 %v3215_v8  ;;  %v3245_v19 = vpack.c.bf16 %v37_v13, %v35_v12  ;;  %v34_v20 = vld [vmem:[%s3697_s1 + $0x80] sm:$0xff]  ;;  %v36_v21 = vld [vmem:[%s3697_s1 + $0x90] sm:$0xff]  ;;  %v2584_v49 = vsel %vm145_vm1, 1.0, %v3168_v3  ;;  %vm1990_vm12 = vcmask 64512   ;;  %vm2224_vm13 = vcmask 31744  }
   0x6   :  { %v2845_v17 = vpack.c.bf16 %v21_v15, %v19_v14  ;;  %2854 = vmatprep.subr.bf16.mxu1 %v3217_v9  ;;  %v20_v22 = vld [vmem:[%s3697_s1 + $0x10] sm:$0xff]  ;;  %v39_v24 = vld [vmem:[%s3697_s1 + $0xa8] sm:$0xff]  ;;  %v41_v25 = vld [vmem:[%s3697_s1 + $0xb8] sm:$0xff]  ;;  %v3263_v26 = vpack.c.bf16 %v36_v21, %v34_v20 }
   0x7   :  { %v2847_v23 = vpack.c.bf16 %v20_v22, %v18_v18  ;;  %v14_v27 = vld [vmem:[%s3698_s0] sm:$0xff]  ;;  %v3269_v28 = vpack.c.bf16 %v41_v25, %v39_v24  ;;  %v40_v30 = vld [vmem:[%s3697_s1 + $0xb0] sm:$0xff]  ;;  %v23_v35 = vld [vmem:[%s3697_s1 + $0x28] sm:$0xff] }
   0x8   :  { %2846 = vmatprep.subr.bf16.mxu0 %v2845_v17  ;;  %v38_v29 = vld [vmem:[%s3697_s1 + $0xa0] sm:$0xff]  ;;  %v15_v50 = vld [vmem:[%s3698_s0 + $0x8] sm:$0xff] }
   0x9   :  { %2856 = vmatpush1.bf16.msra.mxu1 %v3239_v16  ;;  %2848 = vmatpush1.bf16.msra.mxu0 %v2847_v23  ;;  %v3280_v31 = vpack.c.bf16 %v40_v30, %v38_v29  ;;  %v22_v34 = vld [vmem:[%s3697_s1 + $0x20] sm:$0xff] }
   0xa   :  { %2858 = vmatprep.subr.bf16.mxu1 %v3245_v19  ;;  %2866 = vmatprep.subr.bf16.mxu0 %v3204_v4 }
   0xc   :  { %2582 = vmatmul.mubr.msk.f32.vlgmr.msra.gmra.mrb[0].mxu0 %vm59_vm0, %v14_v27 }
   0xd   :  { %2860 = vmatpush1.bf16.msra.mxu1 %v3263_v26  ;;  %2868 = vmatpush1.bf16.msra.mxu0 %v3215_v8 }
   0xe   :  { %2862 = vmatprep.subr.bf16.mxu1 %v3269_v28  ;;  %2870 = vmatprep.subr.bf16.mxu0 %v3217_v9 }
   0xf   :  { %136 = vmatprep.mubr.f32.mxu0 %v3168_v3 }
  0x10   :  { %2583 = vmatmul.mubr.msk.f32.gmra.mrb[2].mxu0 %vm59_vm0, %v15_v50 }
  0x11   :  { %2864 = vmatpush1.bf16.msra.mxu1 %v3280_v31  ;;  %2872 = vmatpush1.bf16.msra.mxu0 %v3239_v16 }
  0x12   :  { %2874 = vmatprep.subr.bf16.mxu0 %v3245_v19  ;;  %2882 = vmatprep.subr.bf16.mxu1 %v3204_v4 }
  0x13   :  { %319 = vmatprep.mubr.f32.mxu0 %v3168_v3 }
  0x14   :  { %217 = vmatmul.mubr.f32.vlgmr.msra.gmra.mrb[0].mxu1 %v3168_v3 }
  0x15   :  { %2876 = vmatpush1.bf16.msra.mxu0 %v3263_v26  ;;  %2884 = vmatpush1.bf16.msra.mxu1 %v3215_v8 }
  0x16   :  { %2878 = vmatprep.subr.bf16.mxu0 %v3269_v28  ;;  %2886 = vmatprep.subr.bf16.mxu1 %v3217_v9 }
  0x17   :  { %414 = vmatprep.mubr.f32.mxu1 %v3168_v3 }
  0x19   :  { %2880 = vmatpush1.bf16.msra.mxu0 %v3280_v31  ;;  %2888 = vmatpush1.bf16.msra.mxu1 %v3239_v16 }
  0x1a   :  { %2890 = vmatprep.subr.bf16.mxu1 %v3245_v19  ;;  %2898 = vmatprep.subr.bf16.mxu0 %v3204_v4 }
  0x1d   :  { %2892 = vmatpush1.bf16.msra.mxu1 %v3263_v26 }
  0x1e   :  { %2894 = vmatprep.subr.bf16.mxu1 %v3269_v28 }
  0x21   :  { %2896 = vmatpush1.bf16.msra.mxu1 %v3280_v31 }
  0x22   :  { %2914 = vmatprep.subr.bf16.mxu1 %v3204_v4 }
  0xdf   :  { %v132_v32 = vpop.f32.mrb[0].mxu0 }
  0xe0   :  { %v134_v33 = vpop.f32.mrb[1].mxu0  ;;  %v3310_v36 = vadd.f32 %v132_v32, %v22_v34 }
  0xe1   :  { %v3312_v37 = vadd.f32 %v134_v33, %v23_v35 }
  0xe2   :  { %v249_v63 = vrot.slane %v3310_v36, 2  ;;  %v344_v25 = vrot.slane %v3310_v36, 4 }
  0xe3   :  { %v3325_v60 = vpop.f32.mrb[2].mxu0  ;;  %v250_v1 = vrot.slane %v3312_v37, 2  ;;  %v345_v29 = vrot.slane %v3312_v37, 4 }
  0xe4   :  { %v3327_v61 = vpop.f32.mrb[3].mxu0 }
  0xe7   :  { %v218_v38 = vpop.f32.mrb[0].mxu1 }
  0xe8   :  { %v219_v39 = vadd.f32 %v218_v38, %v3310_v36  ;;  %v220_v40 = vpop.f32.mrb[1].mxu1 }
  0xe9   :  { %v221_v41 = vadd.f32 %v220_v40, %v3312_v37 }
  0xea   :  { %3074 = vtanh.f32 %v219_v39 }
  0xeb   :  { %3076 = vtanh.f32 %v221_v41 }
  0xf4   :  { %v3075_v43 = vpop.eup %3074 }
  0xf5   :  { %v225_v44 = vmul.f32 0.5, %v3075_v43  ;;  %v3077_v47 = vpop.eup %3076 }
  0xf6   :  { %v226_v54 = vmul.f32 0.5, %v3077_v47 }
  0xf7   :  { %v227_v46 = vadd.f32 0.5, %v225_v44 }
  0xf8   :  { %v228_v55 = vadd.f32 0.5, %v226_v54 }
  0xf9   :  { %v230_v48 = vmul.f32 %v3077_v47, %v227_v46  ;;  %v229_v51 = vmul.f32 0.0, %v227_v46 }
  0xfb   :  { %232 = vrot.lane.b32.xlu0 %v230_v48, %s3169_s4 }
  0xff   :  { %239 = vrot.lane.b32.xlu0 %v2584_v49, %s3169_s4  ;;  %v439_v49 = vrot.slane %v3310_v36, 6 }
 0x16d   :  { %v233_v52 = vpop.permute.xlu0 %232 }
 0x16e   :  { %v235_v53 = vadd.f32 %v233_v52, %v229_v51  ;;  %v440_v51 = vrot.slane %v3312_v37, 6 }
 0x170   :  { %3078 = vtanh.f32 %v235_v53 }
 0x171   :  { %v240_v58 = vpop.permute.xlu0 %239 }
 0x172   :  { %v243_v11 = vmul.f32 %v240_v58, %v235_v53 }
 0x17a   :  { %v3079_v56 = vpop.eup %3078 }
 0x17b   :  { %v237_v57 = vmul.f32 %v3079_v56, %v228_v55 }
 0x17d   :  { %v242_v59 = vmul.f32 %v240_v58, %v237_v57 }
 0x17f   :  { %245 = vrot.lane.b32.xlu1 %v242_v59, %s3169_s4 }
 0x1f1   :  { %v246_v62 = vpop.permute.xlu1 %245 }
 0x1f2   :  { %2585 = vmatmul.mubr.msk.f32.vlgmr.msra.gmra.mrb[4].mxu0 %vm148_vm2, %v246_v62 }
 0x1f3   :  { %2900 = vmatpush1.bf16.msra.mxu0 %v3215_v8  ;;  %509 = vmatprep.mubr.f32.mxu0 %v3168_v3 }
 0x1f4   :  { %2902 = vmatprep.subr.bf16.mxu0 %v3217_v9 }
 0x1f7   :  { %2904 = vmatpush1.bf16.msra.mxu0 %v3239_v16 }
 0x1f8   :  { %2906 = vmatprep.subr.bf16.mxu0 %v3245_v19 }
 0x1fb   :  { %2908 = vmatpush1.bf16.msra.mxu0 %v3263_v26 }
 0x1fc   :  { %2910 = vmatprep.subr.bf16.mxu0 %v3269_v28 }
 0x1ff   :  { %2912 = vmatpush1.bf16.msra.mxu0 %v3280_v31 }
 0x200   :  { %2930 = vmatprep.subr.bf16.mxu0 %v3204_v4 }
 0x2c5   :  { %v321_v0 = vpop.f32.mrb[4].mxu0 }
 0x2c6   :  { %v322_v2 = vadd.f32 %v321_v0, %v249_v63  ;;  %v323_v5 = vpop.f32.mrb[5].mxu0 }
 0x2c7   :  { %v324_v6 = vadd.f32 %v323_v5, %v250_v1 }
 0x2c8   :  { %3080 = vtanh.f32 %v322_v2 }
 0x2c9   :  { %3082 = vtanh.f32 %v324_v6 }
 0x2d2   :  { %v3081_v7 = vpop.eup %3080 }
 0x2d3   :  { %v328_v10 = vmul.f32 0.5, %v3081_v7  ;;  %v3083_v13 = vpop.eup %3082 }
 0x2d4   :  { %v329_v20 = vmul.f32 0.5, %v3083_v13 }
 0x2d5   :  { %v330_v12 = vadd.f32 0.5, %v328_v10 }
 0x2d6   :  { %v331_v21 = vadd.f32 0.5, %v329_v20 }
 0x2d7   :  { %v333_v14 = vmul.f32 %v3083_v13, %v330_v12  ;;  %v332_v15 = vmul.f32 %v330_v12, %v243_v11 }
 0x2d9   :  { %335 = vrot.lane.b32.xlu1 %v333_v14, %s3169_s4 }
 0x34b   :  { %v336_v17 = vpop.permute.xlu1 %335 }
 0x34c   :  { %v338_v18 = vadd.f32 %v336_v17, %v332_v15  ;;  %v24_v17 = vld [vmem:[%s3697_s1 + $0x30] sm:$0xff] }
 0x34d   :  { %v3397_v20 = vadd.f32 %v3325_v60, %v24_v17 }
 0x34e   :  { %3084 = vtanh.f32 %v338_v18 }
 0x358   :  { %v3085_v22 = vpop.eup %3084 }
 0x359   :  { %v3342_v23 = vmul.f32 %v3085_v22, %v331_v21 }
 0x35b   :  { %342 = vrot.lane.b32.xlu0 %v3342_v23, %s3169_s4  ;;  %v2226_v6 = vrot.slane %v3342_v23, 1 }
 0x3cd   :  { %v343_v24 = vpop.permute.xlu0 %342 }
 0x3ce   :  { %2586 = vmatmul.mubr.msk.f32.vlgmr.msra.gmra.mrb[2].mxu1 %vm148_vm2, %v343_v24 }
 0x3cf   :  { %2916 = vmatpush1.bf16.msra.mxu1 %v3215_v8  ;;  %600 = vmatprep.mubr.f32.mxu1 %v3168_v3 }
 0x3d0   :  { %2918 = vmatprep.subr.bf16.mxu1 %v3217_v9 }
 0x3d3   :  { %2920 = vmatpush1.bf16.msra.mxu1 %v3239_v16 }
 0x3d4   :  { %2922 = vmatprep.subr.bf16.mxu1 %v3245_v19 }
 0x3d7   :  { %2924 = vmatpush1.bf16.msra.mxu1 %v3263_v26 }
 0x3d8   :  { %2926 = vmatprep.subr.bf16.mxu1 %v3269_v28 }
 0x3db   :  { %2928 = vmatpush1.bf16.msra.mxu1 %v3280_v31 }
 0x3dc   :  { %2946 = vmatprep.subr.bf16.mxu1 %v3204_v4 }
 0x4a1   :  { %v416_v27 = vpop.f32.mrb[2].mxu1 }
 0x4a2   :  { %v417_v30 = vadd.f32 %v416_v27, %v344_v25  ;;  %v418_v32 = vpop.f32.mrb[3].mxu1 }
 0x4a3   :  { %v419_v33 = vadd.f32 %v418_v32, %v345_v29 }
 0x4a4   :  { %3086 = vtanh.f32 %v417_v30 }
 0x4a5   :  { %3088 = vtanh.f32 %v419_v33 }
 0x4ae   :  { %v3087_v34 = vpop.eup %3086 }
 0x4af   :  { %v423_v35 = vmul.f32 0.5, %v3087_v34  ;;  %v3089_v39 = vpop.eup %3088 }
 0x4b0   :  { %v424_v44 = vmul.f32 0.5, %v3089_v39 }
 0x4b1   :  { %v425_v38 = vadd.f32 0.5, %v423_v35 }
 0x4b2   :  { %v426_v45 = vadd.f32 0.5, %v424_v44 }
 0x4b3   :  { %v428_v40 = vmul.f32 %v3089_v39, %v425_v38  ;;  %v427_v41 = vmul.f32 %v425_v38, %v338_v18  ;;  %v25_v18 = vld [vmem:[%s3697_s1 + $0x38] sm:$0xff] }
 0x4b4   :  { %v3400_v22 = vadd.f32 %v3327_v61, %v25_v18 }
 0x4b5   :  { %430 = vrot.lane.b32.xlu1 %v428_v40, %s3169_s4 }
 0x527   :  { %v431_v42 = vpop.permute.xlu1 %430 }
 0x528   :  { %v433_v43 = vadd.f32 %v431_v42, %v427_v41 }
 0x52a   :  { %3090 = vtanh.f32 %v433_v43 }
 0x534   :  { %v3091_v46 = vpop.eup %3090 }
 0x535   :  { %v435_v47 = vmul.f32 %v3091_v46, %v426_v45  ;;  %v627_v45 = vrot.slane %v3397_v20, 2 }
 0x537   :  { %437 = vrot.lane.b32.xlu0 %v435_v47, %s3169_s4  ;;  %v1860_v37 = vrot.slane %v435_v47, 7  ;;  %v2240_v12 = vsel %vm1874_vm3, %v2226_v6, %v435_v47  ;;  %v722_v6 = vrot.slane %v3397_v20, 4 }
 0x539   :  { %v1875_v11 = vsel %vm1874_vm3, %v3342_v23, %v1860_v37 }
 0x5a9   :  { %v438_v48 = vpop.permute.xlu0 %437 }
 0x5aa   :  { %2587 = vmatmul.mubr.msk.f32.vlgmr.msra.gmra.mrb[6].mxu0 %vm148_vm2, %v438_v48  ;;  %v628_v48 = vrot.slane %v3400_v22, 2 }
 0x5ab   :  { %2932 = vmatpush1.bf16.msra.mxu0 %v3215_v8  ;;  %697 = vmatprep.mubr.f32.mxu0 %v3168_v3 }
 0x5ac   :  { %2934 = vmatprep.subr.bf16.mxu0 %v3217_v9 }
 0x5af   :  { %2936 = vmatpush1.bf16.msra.mxu0 %v3239_v16 }
 0x5b0   :  { %2938 = vmatprep.subr.bf16.mxu0 %v3245_v19 }
 0x5b3   :  { %2940 = vmatpush1.bf16.msra.mxu0 %v3263_v26 }
 0x5b4   :  { %2942 = vmatprep.subr.bf16.mxu0 %v3269_v28 }
 0x5b7   :  { %2944 = vmatpush1.bf16.msra.mxu0 %v3280_v31 }
 0x5b8   :  { %2962 = vmatprep.subr.bf16.mxu0 %v3204_v4 }
 0x67d   :  { %v511_v50 = vpop.f32.mrb[6].mxu0 }
 0x67e   :  { %v512_v52 = vadd.f32 %v511_v50, %v439_v49  ;;  %v513_v53 = vpop.f32.mrb[7].mxu0 }
 0x67f   :  { %v514_v54 = vadd.f32 %v513_v53, %v440_v51 }
 0x680   :  { %3092 = vtanh.f32 %v512_v52 }
 0x681   :  { %3094 = vtanh.f32 %v514_v54 }
 0x68a   :  { %v3093_v55 = vpop.eup %3092 }
 0x68b   :  { %v518_v56 = vmul.f32 0.5, %v3093_v55  ;;  %v3095_v58 = vpop.eup %3094 }
 0x68c   :  { %v519_v36 = vmul.f32 0.5, %v3095_v58 }
 0x68d   :  { %v520_v57 = vadd.f32 0.5, %v518_v56 }
 0x68e   :  { %v521_v1 = vadd.f32 0.5, %v519_v36 }
 0x68f   :  { %v523_v59 = vmul.f32 %v3095_v58, %v520_v57  ;;  %v522_v62 = vmul.f32 %v520_v57, %v433_v43 }
 0x691   :  { %525 = vrot.lane.b32.xlu1 %v523_v59, %s3169_s4 }
 0x703   :  { %v526_v63 = vpop.permute.xlu1 %525 }
 0x704   :  { %v528_v0 = vadd.f32 %v526_v63, %v522_v62 }
 0x706   :  { %3096 = vtanh.f32 %v528_v0 }
 0x710   :  { %v3097_v2 = vpop.eup %3096 }
 0x711   :  { %v530_v5 = vmul.f32 %v3097_v2, %v521_v1 }
 0x713   :  { %532 = vrot.lane.b32.xlu0 %v530_v5, %s3169_s4  ;;  %v1862_v7 = vrot.slane %v530_v5, 6  ;;  %v2228_v10 = vrot.slane %v530_v5, 7 }
 0x715   :  { %v1877_v13 = vsel %vm1876_vm4, %v1875_v11, %v1862_v7  ;;  %v2241_v14 = vsel %vm1876_vm4, %v2240_v12, %v2228_v10 }
 0x785   :  { %v533_v15 = vpop.permute.xlu0 %532 }
 0x786   :  { %2588 = vmatmul.mubr.msk.f32.vlgmr.msra.gmra.mrb[4].mxu1 %vm148_vm2, %v533_v15 }
 0x787   :  { %2948 = vmatpush1.bf16.msra.mxu1 %v3215_v8  ;;  %792 = vmatprep.mubr.f32.mxu1 %v3168_v3 }
 0x788   :  { %2950 = vmatprep.subr.bf16.mxu1 %v3217_v9 }
 0x78b   :  { %2952 = vmatpush1.bf16.msra.mxu1 %v3239_v16 }
 0x78c   :  { %2954 = vmatprep.subr.bf16.mxu1 %v3245_v19 }
 0x78f   :  { %2956 = vmatpush1.bf16.msra.mxu1 %v3263_v26 }
 0x790   :  { %2958 = vmatprep.subr.bf16.mxu1 %v3269_v28 }
 0x793   :  { %2960 = vmatpush1.bf16.msra.mxu1 %v3280_v31 }
 0x794   :  { %2978 = vmatprep.subr.bf16.mxu1 %v3204_v4 }
 0x859   :  { %v602_v21 = vpop.f32.mrb[4].mxu1 }
 0x85a   :  { %v603_v23 = vadd.f32 %v602_v21, %v3397_v20  ;;  %v604_v24 = vpop.f32.mrb[5].mxu1 }
 0x85b   :  { %v605_v4 = vadd.f32 %v604_v24, %v3400_v22 }
 0x85c   :  { %3098 = vtanh.f32 %v603_v23 }
 0x85d   :  { %3100 = vtanh.f32 %v605_v4 }
 0x866   :  { %v3099_v25 = vpop.eup %3098 }
 0x867   :  { %v609_v27 = vmul.f32 0.5, %v3099_v25  ;;  %v3101_v30 = vpop.eup %3100 }
 0x868   :  { %v610_v61 = vmul.f32 0.5, %v3101_v30 }
 0x869   :  { %v611_v29 = vadd.f32 0.5, %v609_v27 }
 0x86a   :  { %v612_v35 = vadd.f32 0.5, %v610_v61 }
 0x86b   :  { %v614_v32 = vmul.f32 %v3101_v30, %v611_v29  ;;  %v613_v60 = vmul.f32 %v611_v29, %v528_v0  ;;  %v817_v29 = vrot.slane %v3397_v20, 6 }
 0x86d   :  { %616 = vrot.lane.b32.xlu1 %v614_v32, %s3169_s4 }
 0x8df   :  { %v617_v33 = vpop.permute.xlu1 %616 }
 0x8e0   :  { %v619_v34 = vadd.f32 %v617_v33, %v613_v60  ;;  %v818_v60 = vrot.slane %v3400_v22, 6 }
 0x8e2   :  { %3102 = vtanh.f32 %v619_v34 }
 0x8ec   :  { %v3103_v38 = vpop.eup %3102 }
 0x8ed   :  { %v621_v39 = vmul.f32 %v3103_v38, %v612_v35 }
 0x8ef   :  { %623 = vrot.lane.b32.xlu0 %v621_v39, %s3169_s4  ;;  %v1864_v40 = vrot.slane %v621_v39, 5  ;;  %v2230_v41 = vrot.slane %v621_v39, 6 }
 0x8f1   :  { %v1879_v42 = vsel %vm1878_vm5, %v1877_v13, %v1864_v40  ;;  %v2242_v43 = vsel %vm1878_vm5, %v2241_v14, %v2230_v41 }
 0x961   :  { %v624_v44 = vpop.permute.xlu0 %623 }
 0x962   :  { %2589 = vmatmul.mubr.msk.f32.vlgmr.msra.gmra.mrb[8].mxu0 %vm148_vm2, %v624_v44 }
 0x963   :  { %2964 = vmatpush1.bf16.msra.mxu0 %v3215_v8  ;;  %887 = vmatprep.mubr.f32.mxu0 %v3168_v3 }
 0x964   :  { %2966 = vmatprep.subr.bf16.mxu0 %v3217_v9 }
 0x967   :  { %2968 = vmatpush1.bf16.msra.mxu0 %v3239_v16 }
 0x968   :  { %2970 = vmatprep.subr.bf16.mxu0 %v3245_v19 }
 0x96b   :  { %2972 = vmatpush1.bf16.msra.mxu0 %v3263_v26 }
 0x96c   :  { %2974 = vmatprep.subr.bf16.mxu0 %v3269_v28 }
 0x96f   :  { %2976 = vmatpush1.bf16.msra.mxu0 %v3280_v31 }
 0xa35   :  { %v699_v46 = vpop.f32.mrb[8].mxu0 }
 0xa36   :  { %v700_v47 = vadd.f32 %v699_v46, %v627_v45  ;;  %v701_v49 = vpop.f32.mrb[9].mxu0 }
 0xa37   :  { %v702_v50 = vadd.f32 %v701_v49, %v628_v48 }
 0xa38   :  { %3104 = vtanh.f32 %v700_v47 }
 0xa39   :  { %3106 = vtanh.f32 %v702_v50 }
 0xa42   :  { %v3105_v51 = vpop.eup %3104 }
 0xa43   :  { %v706_v52 = vmul.f32 0.5, %v3105_v51  ;;  %v3107_v54 = vpop.eup %3106 }
 0xa44   :  { %v707_v59 = vmul.f32 0.5, %v3107_v54 }
 0xa45   :  { %v708_v53 = vadd.f32 0.5, %v706_v52 }
 0xa46   :  { %v709_v62 = vadd.f32 0.5, %v707_v59 }
 0xa47   :  { %v711_v55 = vmul.f32 %v3107_v54, %v708_v53  ;;  %v710_v56 = vmul.f32 %v708_v53, %v619_v34 }
 0xa49   :  { %713 = vrot.lane.b32.xlu1 %v711_v55, %s3169_s4 }
 0xabb   :  { %v714_v57 = vpop.permute.xlu1 %713 }
 0xabc   :  { %v716_v58 = vadd.f32 %v714_v57, %v710_v56 }
 0xabe   :  { %3108 = vtanh.f32 %v716_v58 }
 0xac8   :  { %v3109_v63 = vpop.eup %3108 }
 0xac9   :  { %v718_v0 = vmul.f32 %v3109_v63, %v709_v62  ;;  %v16_v62 = vld [vmem:[%s3698_s0 + $0x10] sm:$0xff]  ;;  %v42_v63 = vld [vmem:[%s3699_s2] sm:$0xff] }
 0xacb   :  { %720 = vrot.lane.b32.xlu0 %v718_v0, %s3169_s4  ;;  %v1866_v36 = vrot.slane %v718_v0, 4  ;;  %v2232_v1 = vrot.slane %v718_v0, 5  ;;  %v43_v0 = vld [vmem:[%s3699_s2 + $0x8] sm:$0xff] }
 0xacd   :  { %v1881_v2 = vsel %vm1880_vm6, %v1879_v42, %v1866_v36  ;;  %v2243_v37 = vsel %vm1880_vm6, %v2242_v43, %v2232_v1  ;;  %v46_v36 = vld [vmem:[%s3699_s2 + $0x20] sm:$0xff]  ;;  %v3170_v1 = vmov 0.0|0.0  }
 0xb3d   :  { %v721_v5 = vpop.permute.xlu0 %720 }
 0xb3e   :  { %2590 = vmatmul.mubr.msk.f32.vlgmr.msra.gmra.mrb[6].mxu1 %vm148_vm2, %v721_v5 }
 0xb3f   :  { %2980 = vmatpush1.bf16.msra.mxu1 %v3215_v8  ;;  %978 = vmatprep.mubr.f32.mxu1 %v3168_v3  ;;  %v723_v8 = vrot.slane %v3400_v22, 4 }
 0xb40   :  { %2982 = vmatprep.subr.bf16.mxu1 %v3217_v9 }
 0xb43   :  { %2984 = vmatpush1.bf16.msra.mxu1 %v3239_v16 }
 0xb44   :  { %2986 = vmatprep.subr.bf16.mxu1 %v3245_v19 }
 0xb47   :  { %2988 = vmatpush1.bf16.msra.mxu1 %v3263_v26 }
 0xb48   :  { %2990 = vmatprep.subr.bf16.mxu1 %v3269_v28 }
 0xb4b   :  { %2992 = vmatpush1.bf16.msra.mxu1 %v3280_v31 }
 0xb4c   :  { %3009 = vmatprep.subr.bf16.mxu1 %v3170_v1 }
 0xc11   :  { %v794_v7 = vpop.f32.mrb[6].mxu1 }
 0xc12   :  { %v795_v10 = vadd.f32 %v794_v7, %v722_v6  ;;  %v796_v11 = vpop.f32.mrb[7].mxu1  ;;  %v17_v6 = vld [vmem:[%s3698_s0 + $0x18] sm:$0xff]  ;;  %v48_v7 = vld [vmem:[%s3699_s2 + $0x30] sm:$0xff]  ;;  %s3172_s0 = smov 32  }
 0xc13   :  { %v797_v12 = vadd.f32 %v796_v11, %v723_v8 }
 0xc14   :  { %3110 = vtanh.f32 %v795_v10  ;;  %v49_v10 = vld [vmem:[%s3699_s2 + $0x38] sm:$0xff] }
 0xc15   :  { %3112 = vtanh.f32 %v797_v12  ;;  %v3481_v8 = vpack.c.bf16 %v49_v10, %v48_v7 }
 0xc1e   :  { %v3111_v9 = vpop.eup %3110 }
 0xc1f   :  { %v801_v16 = vmul.f32 0.5, %v3111_v9  ;;  %v3113_v19 = vpop.eup %3112 }
 0xc20   :  { %v802_v15 = vmul.f32 0.5, %v3113_v19 }
 0xc21   :  { %v803_v13 = vadd.f32 0.5, %v801_v16 }
 0xc22   :  { %v804_v17 = vadd.f32 0.5, %v802_v15 }
 0xc23   :  { %v806_v14 = vmul.f32 %v3113_v19, %v803_v13  ;;  %v805_v26 = vmul.f32 %v803_v13, %v716_v58 }
 0xc25   :  { %808 = vrot.lane.b32.xlu1 %v806_v14, %s3169_s4 }
 0xc97   :  { %v809_v28 = vpop.permute.xlu1 %808 }
 0xc98   :  { %v811_v31 = vadd.f32 %v809_v28, %v805_v26 }
 0xc9a   :  { %3114 = vtanh.f32 %v811_v31 }
 0xca4   :  { %v3115_v18 = vpop.eup %3114 }
 0xca5   :  { %v813_v21 = vmul.f32 %v3115_v18, %v804_v17 }
 0xca7   :  { %815 = vrot.lane.b32.xlu0 %v813_v21, %s3169_s4  ;;  %v1868_v23 = vrot.slane %v813_v21, 3  ;;  %v2234_v24 = vrot.slane %v813_v21, 4 }
 0xca9   :  { %v1883_v4 = vsel %vm1882_vm7, %v1881_v2, %v1868_v23  ;;  %v2244_v25 = vsel %vm1882_vm7, %v2243_v37, %v2234_v24  ;;  %v2993_v2 = vpack.c.bf16 %v43_v0, %v42_v63  ;;  %v47_v37 = vld [vmem:[%s3699_s2 + $0x28] sm:$0xff]  ;;  %v44_v23 = vld [vmem:[%s3699_s2 + $0x10] sm:$0xff] }
 0xcaa   :  { %v3466_v5 = vpack.c.bf16 %v47_v37, %v46_v36 }
 0xcab   :  { %2994 = vmatprep.subr.bf16.mxu0 %v2993_v2 }
 0xd19   :  { %v816_v27 = vpop.permute.xlu0 %815 }
 0xd1a   :  { %2591 = vmatmul.mubr.msk.f32.vlgmr.msra.gmra.mrb[10].mxu0 %vm148_vm2, %v816_v27 }
 0xd1b   :  { %2690 = vmatprep.mubr.msk.f32.mxu0 %vm59_vm0, %v16_v62  ;;  %2996 = vmatpush3.bf16.msra.mxu0 %v2993_v2 }
 0xd1c   :  { %2997 = vmatprep.subr.bf16.mxu0 %v3170_v1 }
 0xd1e   :  { %2691 = vmatmul.mubr.msk.f32.vlgmr.msra.gmra.mrb[12].mxu0 %vm59_vm0, %v17_v6 }
 0xd1f   :  { %2999 = vmatpush3.bf16.msra.mxu0 %v3466_v5  ;;  %2701 = vmatprep.mubr.msk.f32.mxu0 %vm3171_vm9, %v3168_v3 }
 0xd20   :  { %3000 = vmatprep.subr.bf16.mxu0 %v3170_v1 }
 0xd23   :  { %3002 = vmatpush3.bf16.msra.mxu0 %v3481_v8 }
 0xd24   :  { %3003 = vmatprep.subr.bf16.mxu0 %v3170_v1 }
 0xded   :  { %v889_v30 = vpop.f32.mrb[10].mxu0 }
 0xdee   :  { %v890_v32 = vadd.f32 %v889_v30, %v817_v29  ;;  %v891_v33 = vpop.f32.mrb[11].mxu0 }
 0xdef   :  { %v892_v34 = vadd.f32 %v891_v33, %v818_v60 }
 0xdf0   :  { %3116 = vtanh.f32 %v890_v32 }
 0xdf1   :  { %3118 = vtanh.f32 %v892_v34  ;;  %v3499_v17 = vpop.f32.mrb[12].mxu0 }
 0xdf2   :  { %v1072_v18 = vpop.f32.mrb[13].mxu0 }
 0xdf3   :  { %v3511_v24 = vadd.f32 %v1072_v18, %v44_v23 }
 0xdfa   :  { %v3117_v61 = vpop.eup %3116 }
 0xdfb   :  { %v896_v35 = vmul.f32 0.5, %v3117_v61  ;;  %v3119_v39 = vpop.eup %3118 }
 0xdfc   :  { %v897_v20 = vmul.f32 0.5, %v3119_v39 }
 0xdfd   :  { %v898_v38 = vadd.f32 0.5, %v896_v35 }
 0xdfe   :  { %v899_v44 = vadd.f32 0.5, %v897_v20 }
 0xdff   :  { %v901_v40 = vmul.f32 %v3119_v39, %v898_v38  ;;  %v900_v41 = vmul.f32 %v898_v38, %v811_v31 }
 0xe01   :  { %903 = vrot.lane.b32.xlu1 %v901_v40, %s3169_s4 }
 0xe73   :  { %v904_v42 = vpop.permute.xlu1 %903 }
 0xe74   :  { %v906_v43 = vadd.f32 %v904_v42, %v900_v41 }
 0xe76   :  { %3120 = vtanh.f32 %v906_v43 }
 0xe80   :  { %v3121_v45 = vpop.eup %3120 }
 0xe81   :  { %v908_v46 = vmul.f32 %v3121_v45, %v899_v44 }
 0xe83   :  { %910 = vrot.lane.b32.xlu0 %v908_v46, %s3169_s4  ;;  %v1870_v22 = vrot.slane %v908_v46, 2  ;;  %v2236_v47 = vrot.slane %v908_v46, 3 }
 0xe85   :  { %v1885_v48 = vsel %vm1884_vm8, %v1883_v4, %v1870_v22  ;;  %v2245_v49 = vsel %vm1884_vm8, %v2244_v25, %v2236_v47 }
 0xef5   :  { %v911_v50 = vpop.permute.xlu0 %910 }
 0xef6   :  { %2592 = vmatmul.mubr.msk.f32.vlgmr.msra.gmra.mrb[8].mxu1 %vm148_vm2, %v911_v50 }
 0xef7   :  { %2723 = vmatprep.mubr.msk.f32.mxu1 %vm3171_vm9, %v3168_v3  ;;  %3011 = vmatpush3.bf16.msra.mxu1 %v3466_v5 }
 0xef8   :  { %3012 = vmatprep.subr.bf16.mxu1 %v3170_v1 }
 0xefb   :  { %3014 = vmatpush3.bf16.msra.mxu1 %v3481_v8 }
 0xefc   :  { %3021 = vmatprep.subr.bf16.mxu1 %v3170_v1 }
 0xfc9   :  { %v980_v51 = vpop.f32.mrb[8].mxu1 }
 0xfca   :  { %v981_v52 = vadd.f32 %v980_v51, %v817_v29  ;;  %v982_v53 = vpop.f32.mrb[9].mxu1 }
 0xfcb   :  { %v983_v54 = vadd.f32 %v982_v53, %v818_v60 }
 0xfcc   :  { %3122 = vtanh.f32 %v981_v52 }
 0xfcd   :  { %3124 = vtanh.f32 %v983_v54 }
 0xfd6   :  { %v3123_v55 = vpop.eup %3122 }
 0xfd7   :  { %v987_v56 = vmul.f32 0.5, %v3123_v55  ;;  %v3125_v58 = vpop.eup %3124 }
 0xfd8   :  { %v988_v16 = vmul.f32 0.5, %v3125_v58 }
 0xfd9   :  { %v989_v57 = vadd.f32 0.5, %v987_v56 }
 0xfda   :  { %v990_v13 = vadd.f32 0.5, %v988_v16 }
 0xfdb   :  { %v992_v59 = vmul.f32 %v3125_v58, %v989_v57  ;;  %v991_v11 = vmul.f32 %v989_v57, %v906_v43  ;;  %v1185_v43 = vrot.slane %v3511_v24, 2  ;;  %v1282_v57 = vrot.slane %v3511_v24, 4 }
 0xfdd   :  { %994 = vrot.lane.b32.xlu1 %v992_v59, %s3169_s4 }
0x104f   :  { %v995_v12 = vpop.permute.xlu1 %994 }
0x1050   :  { %v997_v9 = vadd.f32 %v995_v12, %v991_v11 }
0x1052   :  { %3126 = vtanh.f32 %v997_v9 }
0x105c   :  { %v3127_v19 = vpop.eup %3126 }
0x105d   :  { %v999_v14 = vmul.f32 %v3127_v19, %v990_v13 }
0x105f   :  { %1082 = vrot.lane.b32.xlu0 %v999_v14, %s3172_s0  ;;  %v1872_v26 = vrot.slane %v999_v14, 1  ;;  %v2238_v28 = vrot.slane %v999_v14, 2 }
0x1061   :  { %v3493_v31 = vsel %vm1886_vm10, %v1885_v48, %v1872_v26  ;;  %v3496_v15 = vsel %vm1886_vm10, %v2245_v49, %v2238_v28 }
0x1063   :  { %1161 = vrot.lane.b32.xlu0 %v997_v9, %s3169_s4 }
0x10d1   :  { %v1083_v21 = vpop.permute.xlu0 %1082 }
0x10d2   :  { %2702 = vmatmul.mubr.msk.f32.vlgmr.msra.gmra.mrb[14].mxu0 %vm1084_vm11, %v1083_v21 }
0x10d3   :  { %3005 = vmatpush3.bf16.msra.mxu0 %v3466_v5  ;;  %2712 = vmatprep.mubr.msk.f32.mxu0 %vm3171_vm9, %v3168_v3 }
0x10d4   :  { %3006 = vmatprep.subr.bf16.mxu0 %v3170_v1 }
0x10d5   :  { %v1162_v34 = vpop.permute.xlu0 %1161 }
0x10d7   :  { %3008 = vmatpush3.bf16.msra.mxu0 %v3481_v8 }
0x10d8   :  { %3015 = vmatprep.subr.bf16.mxu0 %v3170_v1 }
0x11a5   :  { %v1153_v4 = vpop.f32.mrb[14].mxu0 }
0x11a6   :  { %v1154_v25 = vadd.f32 %v1153_v4, %v3511_v24  ;;  %v2703_v27 = vpop.f32.mrb[15].mxu0  ;;  %v1379_v4 = vrot.slane %v3511_v24, 6 }
0x11a8   :  { %3128 = vtanh.f32 %v1154_v25 }
0x11b2   :  { %v3129_v29 = vpop.eup %3128 }
0x11b3   :  { %1166 = vrot.lane.b32.xlu1 %v3129_v29, %s3169_s4  ;;  %v1158_v30 = vmul.f32 0.5, %v3129_v29 }
0x11b5   :  { %v1159_v32 = vadd.f32 0.5, %v1158_v30 }
0x11b7   :  { %v1164_v61 = vmul.f32 %v1162_v34, %v1159_v32 }
0x1225   :  { %v1167_v60 = vpop.permute.xlu1 %1166 }
0x1226   :  { %v1169_v33 = vmul.f32 %v1167_v60, %v1159_v32 }
0x1228   :  { %1171 = vrot.lane.b32.xlu1 %v1169_v33, %s3172_s0 }
0x129a   :  { %v1172_v35 = vpop.permute.xlu1 %1171 }
0x129b   :  { %v1174_v38 = vadd.f32 %v1172_v35, %v1164_v61 }
0x129d   :  { %3130 = vtanh.f32 %v1174_v38 }
0x12a7   :  { %v3131_v39 = vpop.eup %3130 }
0x12a8   :  { %1177 = vrot.lane.b32.xlu0 %v3131_v39, %s3169_s4 }
0x131a   :  { %v1178_v40 = vpop.permute.xlu0 %1177 }
0x131b   :  { %v3517_v41 = vmul.f32 %v1178_v40, %v1159_v32 }
0x131d   :  { %1182 = vrot.lane.b32.xlu1 %v3517_v41, %s3172_s0  ;;  %v2247_v13 = vrot.slane %v3517_v41, 1 }
0x138f   :  { %v1183_v42 = vpop.permute.xlu1 %1182 }
0x1390   :  { %2713 = vmatmul.mubr.msk.f32.vlgmr.msra.gmra.mrb[16].mxu0 %vm1084_vm11, %v1183_v42 }
0x1391   :  { %3017 = vmatpush3.bf16.msra.mxu0 %v3466_v5  ;;  %2734 = vmatprep.mubr.msk.f32.mxu0 %vm3171_vm9, %v3168_v3 }
0x1392   :  { %3018 = vmatprep.subr.bf16.mxu0 %v3170_v1 }
0x1395   :  { %3020 = vmatpush3.bf16.msra.mxu0 %v3481_v8 }
0x1396   :  { %3027 = vmatprep.subr.bf16.mxu0 %v3170_v1 }
0x1463   :  { %v1255_v20 = vpop.f32.mrb[16].mxu0 }
0x1464   :  { %v1256_v44 = vadd.f32 %v1255_v20, %v1185_v43  ;;  %v2714_v45 = vpop.f32.mrb[17].mxu0 }
0x1465   :  { %v45_v45 = vld [vmem:[%s3699_s2 + $0x18] sm:$0xff] }
0x1466   :  { %3132 = vtanh.f32 %v1256_v44 }
0x1470   :  { %v3133_v46 = vpop.eup %3132 }
0x1471   :  { %1264 = vrot.lane.b32.xlu0 %v3133_v46, %s3169_s4  ;;  %v1260_v22 = vmul.f32 0.5, %v3133_v46  ;;  %v3576_v46 = vadd.f32 %v3499_v17, %v45_v45 }
0x1473   :  { %v1261_v47 = vadd.f32 0.5, %v1260_v22 }
0x1475   :  { %v1262_v50 = vmul.f32 %v1261_v47, %v1174_v38 }
0x14e3   :  { %v1265_v48 = vpop.permute.xlu0 %1264 }
0x14e4   :  { %v1267_v49 = vmul.f32 %v1265_v48, %v1261_v47 }
0x14e6   :  { %1269 = vrot.lane.b32.xlu1 %v1267_v49, %s3172_s0 }
0x1558   :  { %v1270_v51 = vpop.permute.xlu1 %1269 }
0x1559   :  { %v1272_v52 = vadd.f32 %v1270_v51, %v1262_v50 }
0x155b   :  { %3134 = vtanh.f32 %v1272_v52 }
0x1565   :  { %v3135_v53 = vpop.eup %3134 }
0x1566   :  { %1275 = vrot.lane.b32.xlu0 %v3135_v53, %s3169_s4 }
0x15d8   :  { %v1276_v54 = vpop.permute.xlu0 %1275 }
0x15d9   :  { %v1278_v55 = vmul.f32 %v1276_v54, %v1261_v47 }
0x15db   :  { %1280 = vrot.lane.b32.xlu1 %v1278_v55, %s3172_s0  ;;  %v1888_v12 = vrot.slane %v1278_v55, 7  ;;  %v2261_v28 = vsel %vm1874_vm3, %v2247_v13, %v1278_v55 }
0x15dd   :  { %v1903_v26 = vsel %vm1874_vm3, %v3517_v41, %v1888_v12 }
0x164d   :  { %v1281_v56 = vpop.permute.xlu1 %1280 }
0x164e   :  { %2724 = vmatmul.mubr.msk.f32.vlgmr.msra.gmra.mrb[10].mxu1 %vm1084_vm11, %v1281_v56 }
0x164f   :  { %3023 = vmatpush3.bf16.msra.mxu1 %v3466_v5  ;;  %2745 = vmatprep.mubr.msk.f32.mxu1 %vm3171_vm9, %v3168_v3 }
0x1650   :  { %3024 = vmatprep.subr.bf16.mxu1 %v3170_v1 }
0x1653   :  { %3026 = vmatpush3.bf16.msra.mxu1 %v3481_v8 }
0x1654   :  { %3033 = vmatprep.subr.bf16.mxu1 %v3170_v1 }
0x1721   :  { %v1352_v58 = vpop.f32.mrb[10].mxu1 }
0x1722   :  { %v1353_v59 = vadd.f32 %v1352_v58, %v1282_v57  ;;  %v2725_v62 = vpop.f32.mrb[11].mxu1 }
0x1724   :  { %3136 = vtanh.f32 %v1353_v59 }
0x172e   :  { %v3137_v63 = vpop.eup %3136 }
0x172f   :  { %1361 = vrot.lane.b32.xlu0 %v3137_v63, %s3169_s4  ;;  %v1357_v0 = vmul.f32 0.5, %v3137_v63 }
0x1731   :  { %v1358_v36 = vadd.f32 0.5, %v1357_v0 }
0x1733   :  { %v1359_v6 = vmul.f32 %v1358_v36, %v1272_v52 }
0x17a1   :  { %v1362_v2 = vpop.permute.xlu0 %1361 }
0x17a2   :  { %v1364_v37 = vmul.f32 %v1362_v2, %v1358_v36  ;;  %v1572_v2 = vrot.slane %v3576_v46, 2 }
0x17a4   :  { %1366 = vrot.lane.b32.xlu1 %v1364_v37, %s3172_s0 }
0x1816   :  { %v1367_v7 = vpop.permute.xlu1 %1366 }
0x1817   :  { %v1369_v10 = vadd.f32 %v1367_v7, %v1359_v6 }
0x1819   :  { %3138 = vtanh.f32 %v1369_v10 }
0x1823   :  { %v3139_v11 = vpop.eup %3138 }
0x1824   :  { %1372 = vrot.lane.b32.xlu0 %v3139_v11, %s3169_s4 }
0x1896   :  { %v1373_v9 = vpop.permute.xlu0 %1372 }
0x1897   :  { %v1375_v16 = vmul.f32 %v1373_v9, %v1358_v36 }
0x1899   :  { %v1890_v19 = vrot.slane %v1375_v16, 6  ;;  %v2249_v14 = vrot.slane %v1375_v16, 7  ;;  %1377 = vrot.lane.b32.xlu1 %v1375_v16, %s3172_s0 }
0x189b   :  { %v1904_v18 = vsel %vm1876_vm4, %v1903_v26, %v1890_v19  ;;  %v2262_v21 = vsel %vm1876_vm4, %v2261_v28, %v2249_v14 }
0x190b   :  { %v1378_v23 = vpop.permute.xlu1 %1377 }
0x190c   :  { %2735 = vmatmul.mubr.msk.f32.vlgmr.msra.gmra.mrb[18].mxu0 %vm1084_vm11, %v1378_v23 }
0x190d   :  { %3029 = vmatpush3.bf16.msra.mxu0 %v3466_v5  ;;  %2756 = vmatprep.mubr.msk.f32.mxu0 %vm3171_vm9, %v3168_v3 }
0x190e   :  { %3030 = vmatprep.subr.bf16.mxu0 %v3170_v1 }
0x1911   :  { %3032 = vmatpush3.bf16.msra.mxu0 %v3481_v8 }
0x1912   :  { %3039 = vmatprep.subr.bf16.mxu0 %v3170_v1 }
0x19df   :  { %v1449_v25 = vpop.f32.mrb[18].mxu0 }
0x19e0   :  { %v1450_v27 = vadd.f32 %v1449_v25, %v1379_v4  ;;  %v2736_v29 = vpop.f32.mrb[19].mxu0  ;;  %v1669_v25 = vrot.slane %v3576_v46, 4 }
0x19e2   :  { %3140 = vtanh.f32 %v1450_v27 }
0x19ec   :  { %v3141_v30 = vpop.eup %3140 }
0x19ed   :  { %1458 = vrot.lane.b32.xlu0 %v3141_v30, %s3169_s4  ;;  %v1454_v32 = vmul.f32 0.5, %v3141_v30 }
0x19ef   :  { %v1455_v60 = vadd.f32 0.5, %v1454_v32 }
0x19f1   :  { %v1456_v61 = vmul.f32 %v1455_v60, %v1369_v10 }
0x1a5f   :  { %v1459_v33 = vpop.permute.xlu0 %1458 }
0x1a60   :  { %v1461_v34 = vmul.f32 %v1459_v33, %v1455_v60 }
0x1a62   :  { %1463 = vrot.lane.b32.xlu1 %v1461_v34, %s3172_s0 }
0x1ad4   :  { %v1464_v35 = vpop.permute.xlu1 %1463 }
0x1ad5   :  { %v1466_v38 = vadd.f32 %v1464_v35, %v1456_v61 }
0x1ad7   :  { %3142 = vtanh.f32 %v1466_v38 }
0x1ae1   :  { %v3143_v39 = vpop.eup %3142 }
0x1ae2   :  { %1469 = vrot.lane.b32.xlu0 %v3143_v39, %s3169_s4 }
0x1b54   :  { %v1470_v24 = vpop.permute.xlu0 %1469 }
0x1b55   :  { %v1472_v40 = vmul.f32 %v1470_v24, %v1455_v60 }
0x1b57   :  { %v1892_v41 = vrot.slane %v1472_v40, 5  ;;  %v2251_v42 = vrot.slane %v1472_v40, 6  ;;  %1474 = vrot.lane.b32.xlu1 %v1472_v40, %s3172_s0 }
0x1b59   :  { %v1905_v43 = vsel %vm1878_vm5, %v1904_v18, %v1892_v41  ;;  %v2263_v20 = vsel %vm1878_vm5, %v2262_v21, %v2251_v42 }
0x1bc9   :  { %v1475_v44 = vpop.permute.xlu1 %1474 }
0x1bca   :  { %2746 = vmatmul.mubr.msk.f32.vlgmr.msra.gmra.mrb[12].mxu1 %vm1084_vm11, %v1475_v44 }
0x1bcb   :  { %3035 = vmatpush3.bf16.msra.mxu1 %v3466_v5  ;;  %2767 = vmatprep.mubr.msk.f32.mxu1 %vm3171_vm9, %v3168_v3 }
0x1bcc   :  { %3036 = vmatprep.subr.bf16.mxu1 %v3170_v1 }
0x1bcf   :  { %3038 = vmatpush3.bf16.msra.mxu1 %v3481_v8 }
0x1bd0   :  { %2781 = vmatprep.subr.mxu1 %v3168_v3 }
0x1c9d   :  { %v1544_v22 = vpop.f32.mrb[12].mxu1 }
0x1c9e   :  { %v1545_v47 = vadd.f32 %v1544_v22, %v3576_v46  ;;  %v2747_v48 = vpop.f32.mrb[13].mxu1  ;;  %v1766_v22 = vrot.slane %v3576_v46, 6 }
0x1ca0   :  { %3144 = vtanh.f32 %v1545_v47 }
0x1caa   :  { %v3145_v49 = vpop.eup %3144 }
0x1cab   :  { %1553 = vrot.lane.b32.xlu0 %v3145_v49, %s3169_s4  ;;  %v1549_v50 = vmul.f32 0.5, %v3145_v49 }
0x1cad   :  { %v1550_v51 = vadd.f32 0.5, %v1549_v50 }
0x1caf   :  { %v1551_v54 = vmul.f32 %v1550_v51, %v1466_v38 }
0x1d1d   :  { %v1554_v52 = vpop.permute.xlu0 %1553 }
0x1d1e   :  { %v1556_v53 = vmul.f32 %v1554_v52, %v1550_v51 }
0x1d20   :  { %1558 = vrot.lane.b32.xlu1 %v1556_v53, %s3172_s0 }
0x1d92   :  { %v1559_v55 = vpop.permute.xlu1 %1558 }
0x1d93   :  { %v1561_v56 = vadd.f32 %v1559_v55, %v1551_v54 }
0x1d95   :  { %3146 = vtanh.f32 %v1561_v56 }
0x1d9f   :  { %v3147_v17 = vpop.eup %3146 }
0x1da0   :  { %1564 = vrot.lane.b32.xlu0 %v3147_v17, %s3169_s4 }
0x1e12   :  { %v1565_v57 = vpop.permute.xlu0 %1564 }
0x1e13   :  { %v1567_v58 = vmul.f32 %v1565_v57, %v1550_v51  ;;  %v54_v57 = vld [vmem:[%s3699_s2 + $0x60] sm:$0xff] }
0x1e15   :  { %v1894_v59 = vrot.slane %v1567_v58, 4  ;;  %v2253_v62 = vrot.slane %v1567_v58, 5  ;;  %1569 = vrot.lane.b32.xlu1 %v1567_v58, %s3172_s0 }
0x1e17   :  { %v1906_v63 = vsel %vm1880_vm6, %v1905_v43, %v1894_v59  ;;  %v2264_v0 = vsel %vm1880_vm6, %v2263_v20, %v2253_v62  ;;  %v57_v59 = vld [vmem:[%s3699_s2 + $0x78] sm:$0xff] }
0x1e87   :  { %v1570_v36 = vpop.permute.xlu1 %1569 }
0x1e88   :  { %2757 = vmatmul.mubr.msk.f32.vlgmr.msra.gmra.mrb[20].mxu0 %vm1084_vm11, %v1570_v36 }
0x1e89   :  { %3041 = vmatpush3.bf16.msra.mxu0 %v3466_v5  ;;  %2778 = vmatprep.mubr.msk.f32.mxu0 %vm3171_vm9, %v3168_v3 }
0x1e8a   :  { %3042 = vmatprep.subr.bf16.mxu0 %v3170_v1 }
0x1e8d   :  { %3044 = vmatpush3.bf16.msra.mxu0 %v3481_v8 }
0x1e8e   :  { %3045 = vmatprep.subr.bf16.mxu0 %v3170_v1 }
0x1f5b   :  { %v1642_v37 = vpop.f32.mrb[20].mxu0 }
0x1f5c   :  { %v1643_v6 = vadd.f32 %v1642_v37, %v1572_v2  ;;  %v2758_v7 = vpop.f32.mrb[21].mxu0 }
0x1f5e   :  { %3148 = vtanh.f32 %v1643_v6 }
0x1f68   :  { %v3149_v10 = vpop.eup %3148 }
0x1f69   :  { %1651 = vrot.lane.b32.xlu0 %v3149_v10, %s3169_s4  ;;  %v1647_v11 = vmul.f32 0.5, %v3149_v10 }
0x1f6b   :  { %v1648_v5 = vadd.f32 0.5, %v1647_v11 }
0x1f6d   :  { %v1649_v16 = vmul.f32 %v1648_v5, %v1561_v56 }
0x1fdb   :  { %v1652_v12 = vpop.permute.xlu0 %1651 }
0x1fdc   :  { %v1654_v9 = vmul.f32 %v1652_v12, %v1648_v5 }
0x1fde   :  { %1656 = vrot.lane.b32.xlu1 %v1654_v9, %s3172_s0 }
0x2050   :  { %v1657_v13 = vpop.permute.xlu1 %1656 }
0x2051   :  { %v1659_v8 = vadd.f32 %v1657_v13, %v1649_v16 }
0x2053   :  { %3150 = vtanh.f32 %v1659_v8 }
0x205d   :  { %v3151_v19 = vpop.eup %3150 }
0x205e   :  { %1662 = vrot.lane.b32.xlu0 %v3151_v19, %s3169_s4 }
0x20d0   :  { %v1663_v14 = vpop.permute.xlu0 %1662 }
0x20d1   :  { %v1665_v26 = vmul.f32 %v1663_v14, %v1648_v5 }
0x20d3   :  { %v1896_v28 = vrot.slane %v1665_v26, 3  ;;  %v2255_v18 = vrot.slane %v1665_v26, 4  ;;  %1667 = vrot.lane.b32.xlu1 %v1665_v26, %s3172_s0 }
0x20d5   :  { %v1907_v21 = vsel %vm1882_vm7, %v1906_v63, %v1896_v28  ;;  %v2265_v23 = vsel %vm1882_vm7, %v2264_v0, %v2255_v18 }
0x2145   :  { %v1668_v4 = vpop.permute.xlu1 %1667 }
0x2146   :  { %2768 = vmatmul.mubr.msk.f32.vlgmr.msra.gmra.mrb[14].mxu1 %vm1084_vm11, %v1668_v4 }
0x2147   :  { %2783 = vmatprep.mubr.msk.f32.mxu1 %vm3171_vm9, %v3168_v3 }
0x2219   :  { %v1739_v27 = vpop.f32.mrb[14].mxu1 }
0x221a   :  { %v1740_v29 = vadd.f32 %v1739_v27, %v1669_v25  ;;  %v2769_v30 = vpop.f32.mrb[15].mxu1 }
0x221c   :  { %3152 = vtanh.f32 %v1740_v29 }
0x2226   :  { %v3153_v32 = vpop.eup %3152 }
0x2227   :  { %1748 = vrot.lane.b32.xlu0 %v3153_v32, %s3169_s4  ;;  %v1744_v60 = vmul.f32 0.5, %v3153_v32 }
0x2229   :  { %v1745_v33 = vadd.f32 0.5, %v1744_v60 }
0x222b   :  { %v1746_v35 = vmul.f32 %v1745_v33, %v1659_v8 }
0x2299   :  { %v1749_v34 = vpop.permute.xlu0 %1748 }
0x229a   :  { %v1751_v61 = vmul.f32 %v1749_v34, %v1745_v33 }
0x229c   :  { %1753 = vrot.lane.b32.xlu1 %v1751_v61, %s3172_s0 }
0x230e   :  { %v1754_v38 = vpop.permute.xlu1 %1753 }
0x230f   :  { %v1756_v39 = vadd.f32 %v1754_v38, %v1746_v35  ;;  %v50_v38 = vld [vmem:[%s3699_s2 + $0x40] sm:$0xff] }
0x2311   :  { %3154 = vtanh.f32 %v1756_v39 }
0x231b   :  { %v3155_v24 = vpop.eup %3154 }
0x231c   :  { %1759 = vrot.lane.b32.xlu0 %v3155_v24, %s3169_s4  ;;  %v52_v24 = vld [vmem:[%s3699_s2 + $0x50] sm:$0xff] }
0x238e   :  { %v1760_v40 = vpop.permute.xlu0 %1759 }
0x238f   :  { %v1762_v41 = vmul.f32 %v1760_v40, %v1745_v33 }
0x2391   :  { %v1898_v42 = vrot.slane %v1762_v41, 2  ;;  %v2257_v43 = vrot.slane %v1762_v41, 3  ;;  %1764 = vrot.lane.b32.xlu1 %v1762_v41, %s3172_s0  ;;  %v53_v41 = vld [vmem:[%s3699_s2 + $0x58] sm:$0xff] }
0x2393   :  { %v1908_v20 = vsel %vm1884_vm8, %v1907_v21, %v1898_v42  ;;  %v2266_v44 = vsel %vm1884_vm8, %v2265_v23, %v2257_v43  ;;  %v3055_v42 = vpack.c.bf16 %v53_v41, %v52_v24 }
0x2403   :  { %v1765_v45 = vpop.permute.xlu1 %1764 }
0x2404   :  { %2779 = vmatmul.mubr.msk.f32.vlgmr.msra.gmra.mrb[22].mxu0 %vm1084_vm11, %v1765_v45 }
0x2405   :  { %2799 = vmatprep.mubr.msk.f32.mxu0 %vm3171_vm9, %v3168_v3 }
0x24d7   :  { %v1836_v47 = vpop.f32.mrb[22].mxu0 }
0x24d8   :  { %v1837_v48 = vadd.f32 %v1836_v47, %v1766_v22  ;;  %v2780_v49 = vpop.f32.mrb[23].mxu0  ;;  %v2608_v47 = vld [vmem:[%s3699_s2 + $0x80] ss:$0 sm:$0xff] }
0x24da   :  { %3156 = vtanh.f32 %v1837_v48 }
0x24e4   :  { %v3157_v50 = vpop.eup %3156 }
0x24e5   :  { %1845 = vrot.lane.b32.xlu0 %v3157_v50, %s3169_s4  ;;  %v1841_v51 = vmul.f32 0.5, %v3157_v50 }
0x24e7   :  { %v1842_v52 = vadd.f32 0.5, %v1841_v51 }
0x24e9   :  { %v1843_v46 = vmul.f32 %v1842_v52, %v1756_v39  ;;  %v51_v39 = vld [vmem:[%s3699_s2 + $0x48] sm:$0xff] }
0x24ea   :  { %v3052_v40 = vpack.c.bf16 %v51_v39, %v50_v38 }
0x2557   :  { %v1846_v53 = vpop.permute.xlu0 %1845 }
0x2558   :  { %v1848_v54 = vmul.f32 %v1846_v53, %v1842_v52 }
0x255a   :  { %1850 = vrot.lane.b32.xlu1 %v1848_v54, %s3172_s0 }
0x255e   :  { %1914 = vrot.lane.b32.xlu1 %v3493_v31, %s3172_s0  ;;  %v55_v31 = vld [vmem:[%s3699_s2 + $0x68] sm:$0xff] }
0x255f   :  { %v3046_v58 = vpack.c.bf16 %v55_v31, %v54_v57 }
0x2561   :  { %3047 = vmatpush3.bf16.msra.mxu0 %v3046_v58 }
0x2562   :  { %2272 = vrot.lane.b32.xlu1 %v3496_v15, %s3172_s0  ;;  %v56_v15 = vld [vmem:[%s3699_s2 + $0x70] sm:$0xff]  ;;  %3048 = vmatprep.subr.bf16.mxu0 %v3170_v1 }
0x2563   :  { %v3049_v63 = vpack.c.bf16 %v57_v59, %v56_v15 }
0x2565   :  { %3050 = vmatpush3.bf16.msra.mxu0 %v3049_v63 }
0x2566   :  { %2813 = vmatprep.subr.mxu0 %v3168_v3 }
0x25cc   :  { %v1851_v55 = vpop.permute.xlu1 %1850 }
0x25cd   :  { %v1853_v56 = vadd.f32 %v1851_v55, %v1843_v46 }
0x25cf   :  { %3158 = vtanh.f32 %v1853_v56 }
0x25d0   :  { %v1915_v17 = vpop.permute.xlu1 %1914 }
0x25d1   :  { %2782 = vmatpush3.xpose.msk.msra.mxu1 %vm1084_vm11, %v1915_v17 }
0x25d2   :  { %2786 = vmatprep.subr.mxu1 %v3168_v3 }
0x25d4   :  { %v3640_v11 = vpop.permute.xlu1 %2272 }
0x25d9   :  { %v3159_v62 = vpop.eup %3158 }
0x25da   :  { %1856 = vrot.lane.b32.xlu0 %v3159_v62, %s3169_s4 }
0x264c   :  { %v1857_v0 = vpop.permute.xlu0 %1856 }
0x264d   :  { %v1859_v36 = vmul.f32 %v1857_v0, %v1842_v52 }
0x264f   :  { %v1901_v2 = vrot.slane %v1859_v36, 1  ;;  %v2259_v37 = vrot.slane %v1859_v36, 2 }
0x2651   :  { %v1909_v6 = vsel %vm1886_vm10, %v1908_v20, %v1901_v2  ;;  %v2267_v7 = vsel %vm1886_vm10, %v2266_v44, %v2259_v37 }
0x2652   :  { %1911 = vrot.lane.b32.xlu0 %v1909_v6, %s3172_s0 }
0x2656   :  { %2269 = vrot.lane.b32.xlu0 %v2267_v7, %s3172_s0 }
0x26c4   :  { %v1912_v10 = vpop.permute.xlu0 %1911 }
0x26c5   :  { %2784 = vmatmul.mubr.msk.f32.vlgmr.msra.gmra.mrb[16].mxu1 %vm1084_vm11, %v1912_v10  ;;  %2800 = vmatmul.mubr.msk.f32.vlgmr.msra.gmra.mrb[24].mxu0 %vm1084_vm11, %v1912_v10 }
0x26c6   :  { %2787 = vmatpush3.msra.mxu1 %v1915_v17  ;;  %2814 = vmatpush3.xpose.msk.msra.mxu0 %vm1084_vm11, %v3640_v11 }
0x26c7   :  { %2815 = vmatprep.mubr.msk.f32.mxu0 %vm3171_vm9, %v3168_v3  ;;  %3057 = vmatprep.subr.bf16.mxu0 %v3170_v1 }
0x26c8   :  { %v2270_v5 = vpop.permute.xlu0 %2269  ;;  %2788 = vmatprep.mubr.msk.f32.mxu1 %vm3171_vm9, %v3168_v3  ;;  %3051 = vmatprep.subr.bf16.mxu1 %v3170_v1 }
0x26c9   :  { %2816 = vmatmul.mubr.msk.f32.vlgmr.msra.gmra.mrb[26].mxu0 %vm1084_vm11, %v2270_v5 }
0x26ca   :  { %3059 = vmatpush3.bf16.msra.mxu0 %v3046_v58  ;;  %2831 = vmatprep.mubr.msk.f32.mxu0 %vm3171_vm9, %v3168_v3 }
0x26cb   :  { %3060 = vmatprep.subr.bf16.mxu0 %v3170_v1 }
0x26ce   :  { %3062 = vmatpush3.bf16.msra.mxu0 %v3049_v63 }
0x26d1   :  { %2832 = vmatmul.mubr.msk.f32.vlgmr.msra.gmra.mrb[28].mxu0 %vm1084_vm11, %v2270_v5 }
0x2798   :  { %v1986_v12 = vpop.f32.mrb[16].mxu1  ;;  %v2142_v9 = vpop.f32.mrb[24].mxu0 }
0x2799   :  { %v2785_v16 = vpop.f32.mrb[17].mxu1  ;;  %v2801_v13 = vpop.f32.mrb[25].mxu0  ;;  %v1991_v8 = vsel %vm1990_vm12, %v1986_v12, -inf }
0x279a   :  { %1992 = vmax.xlane.f32.xlu1 %v1991_v8 }
0x279c   :  { %v2344_v19 = vpop.f32.mrb[26].mxu0 }
0x279d   :  { %v2817_v14 = vpop.f32.mrb[27].mxu0  ;;  %v2348_v27 = vsel %vm1990_vm12, %v2344_v19, -inf }
0x27a4   :  { %v2499_v26 = vpop.f32.mrb[28].mxu0 }
0x27a5   :  { %v2833_v28 = vpop.f32.mrb[29].mxu0 }
0x2827   :  { %v1993_v18 = vpop.xlane.xlu1 %1992 }
0x2828   :  { %v1994_v21 = vsub.f32 %v1986_v12, %v1993_v18 }
0x282a   :  { %v1995_v23 = vmul.f32 1.442695, %v1994_v21 }
0x282c   :  { %3160 = vpow2.f32 %v1995_v23 }
0x2836   :  { %v3161_v4 = vpop.eup %3160 }
0x2837   :  { %v1997_v25 = vsel %vm1990_vm12, %v3161_v4, 0.0 }
0x2838   :  { %1998 = vadd.xlane.f32.xlu0 %v1997_v25 }
0x283c   :  { %2349 = vmax.xlane.f32.xlu0 %v2348_v27 }
0x28c5   :  { %v1999_v29 = vpop.xlane.xlu0 %1998 }
0x28c6   :  { %3162 = vrcp.f32 %v1999_v29 }
0x28c9   :  { %v2350_v30 = vpop.xlane.xlu0 %2349 }
0x28ca   :  { %v2351_v32 = vsub.f32 %v2344_v19, %v2350_v30 }
0x28cc   :  { %v2352_v60 = vmul.f32 1.442695, %v2351_v32 }
0x28ce   :  { %3164 = vpow2.f32 %v2352_v60 }
0x28d0   :  { %v3163_v33 = vpop.eup %3162 }
0x28d1   :  { %v2001_v34 = vmul.f32 %v3163_v33, %v3161_v4 }
0x28d3   :  { %2789 = vmatmul.mubr.msk.f32.vlgmr.msra.gmra.mrb[18].mxu1 %vm1990_vm12, %v2001_v34 }
0x28d4   :  { %2810 = vmatprep.mubr.msk.f32.mxu1 %vm3171_vm9, %v3168_v3  ;;  %3053 = vmatpush3.bf16.msra.mxu1 %v3052_v40 }
0x28d5   :  { %3054 = vmatprep.subr.bf16.mxu1 %v3170_v1 }
0x28d8   :  { %v3165_v61 = vpop.eup %3164  ;;  %3056 = vmatpush3.bf16.msra.mxu1 %v3055_v42 }
0x28d9   :  { %v2354_v35 = vsel %vm1990_vm12, %v3165_v61, 0.0  ;;  %2818 = vmatprep.subr.mxu1 %v3168_v3 }
0x28da   :  { %2355 = vadd.xlane.f32.xlu1 %v2354_v35 }
0x2967   :  { %v2356_v43 = vpop.xlane.xlu1 %2355 }
0x2968   :  { %3166 = vrcp.f32 %v2356_v43 }
0x2972   :  { %v3167_v20 = vpop.eup %3166 }
0x2973   :  { %v2358_v22 = vmul.f32 %v3167_v20, %v3165_v61 }
0x29a6   :  { %v2072_v44 = vpop.f32.mrb[18].mxu1 }
0x29a7   :  { %v2790_v45 = vpop.f32.mrb[19].mxu1  ;;  %2811 = vmatmul.mubr.msk.f32.vlgmr.msra.gmra.mrb[20].mxu1 %vm1084_vm11, %v2072_v44 }
0x29a8   :  { %2819 = vmatpush3.msra.mxu1 %v3640_v11  ;;  %2820 = vmatprep.mubr.msk.f32.mxu1 %vm3171_vm9, %v3168_v3 }
0x29a9   :  { %3063 = vmatprep.subr.bf16.mxu1 %v3170_v1 }
0x29ab   :  { %2821 = vmatmul.mubr.msk.f32.vlgmr.msra.gmra.mrb[22].mxu1 %vm1990_vm12, %v2358_v22 }
0x29ac   :  { %3065 = vmatpush3.bf16.msra.mxu1 %v3052_v40  ;;  %2842 = vmatprep.mubr.msk.f32.mxu1 %vm3171_vm9, %v3168_v3 }
0x29ad   :  { %3066 = vmatprep.subr.bf16.mxu1 %v3170_v1 }
0x29b0   :  { %3068 = vmatpush3.bf16.msra.mxu1 %v3055_v42 }
0x2a7a   :  { %v2215_v48 = vpop.f32.mrb[20].mxu1 }
0x2a7b   :  { %v2216_v49 = vadd.f32 %v2215_v48, %v2142_v9  ;;  %v2812_v50 = vpop.f32.mrb[21].mxu1 }
0x2a7d   :  { %v2223_v51 = vadd.f32 %v2608_v47, %v2216_v49 }
0x2a7e   :  { %v2429_v52 = vpop.f32.mrb[22].mxu1 }
0x2a7f   :  { %2225 = vst.msk [vmem:[%s3700_s3] sm:$0xff] %vm2224_vm13, %v2223_v51  ;;  %v2822_v53 = vpop.f32.mrb[23].mxu1  ;;  %2843 = vmatmul.mubr.msk.f32.vlgmr.msra.gmra.mrb[24].mxu1 %vm1084_vm11, %v2429_v52 }
0x2b52   :  { %v2572_v3 = vpop.f32.mrb[24].mxu1 }
0x2b53   :  { %v2573_v1 = vadd.f32 %v2572_v3, %v2499_v26  ;;  %v2844_v54 = vpop.f32.mrb[25].mxu1 }
0x2b55   :  { %v2576_v46 = vadd.f32 %v2608_v47, %v2573_v1 }
0x2b57   :  { %2577 = vst.msk [vmem:[%s3700_s3 + $0x8] sm:$0xff] %vm2224_vm13, %v2576_v46 }

</bundles_post_ra>
